<compile_context>
chip_gen: v7x
topology: tpu7x:2x2x1
jax: 0.10.0
libtpu: 0.0.40
codegen_flags: <defaults>
</compile_context>

<pallas_src>
import jax
import jax.numpy as jnp
from jax.experimental import pallas as pl
from jax.experimental.pallas import tpu as pltpu


def _round_up(n, m):
    return (n + m - 1) // m * m


def _textcnn_head_kernel(
    x_ref,        # (B_tile, S, Hp)   bf16  hidden states (batch tile)
    pooled_ref,   # (B_tile, 1, Hp)   bf16  bert pooler output
    w_all_ref,    # (Hp, 9*Hp)        bf16  all conv taps [w1(2) | w2(3) | w3(4)]
    b1_ref, b2_ref, b3_ref,           # (1, Hp) f32 conv biases
    wfc1_ref, wfc2_ref, wfc3_ref,     # (Hp, Cp) bf16  TextCNN.fc split along concat
    bfc_ref,                          # (1, Cp) f32
    wcp_ref, wcc_ref,                 # (Hp, Cp), (Cp, Cp) bf16  classifier split
    bc_ref,                           # (1, Cp) f32
    out_ref,      # (B_tile, 1, Cp)   f32  logits (lane-padded)
    xpad_ref,     # scratch (B_tile, Spad, Hp) bf16: [x_0..x_{S-1}, 0, 0, ...]
):
    Bt, S, Hp = x_ref.shape
    Spad = xpad_ref.shape[1]
    Cp = out_ref.shape[2]

    # Conv1d(padding=1) zero halo built in VMEM (no wrapper-side pad / HBM round trip).
    # Layout: rows [0:S] = x, rows [S:Spad] = 0 (row S plays the trailing zero pad).
    xpad_ref[...] = jnp.zeros(xpad_ref.shape, xpad_ref.dtype)
    xpad_ref[:, 0:S, :] = x_ref[...]

    # One fused projection for all 9 taps: (Bt*Spad, Hp) @ (Hp, 9*Hp), bf16 -> f32 acc.
    xp = xpad_ref[...].reshape(Bt * Spad, Hp)
    p = jnp.dot(xp, w_all_ref[...], preferred_element_type=jnp.float32)
    p = p.reshape(Bt, Spad, 9 * Hp)

    def conv_relu_max(base, k, b_ref):
        # torch Conv1d(H, H, k, padding=1) + ReLU + max over time.
        # Output positions l = 0..L-1, L = S+3-k.  Padded row r (torch) maps to
        # p row r-1 for r = 1..S+1 (row S is the zero tail); r = 0 contributes 0.
        L = S + 3 - k
        b = b_ref[...][None]                                   # (1, 1, Hp) f32
        # positions l = 1..L-1: every tap j reads p rows j .. j+L-2 (contiguous slices)
        acc = p[:, 0:L - 1, base * Hp:(base + 1) * Hp]
        for j in range(1, k):
            acc = acc + p[:, j:j + L - 1, (base + j) * Hp:(base + j + 1) * Hp]
        m = jnp.max(jnp.maximum(acc + b, 0.0), axis=1)         # (Bt, Hp)
        # position l = 0: tap 0 hits the leading zero pad; tap j>=1 reads p row j-1
        acc0 = p[:, 0:1, (base + 1) * Hp:(base + 2) * Hp]
        for j in range(2, k):
            acc0 = acc0 + p[:, j - 1:j, (base + j) * Hp:(base + j + 1) * Hp]
        m0 = jnp.max(jnp.maximum(acc0 + b, 0.0), axis=1)       # (Bt, Hp)
        return jnp.maximum(m, m0)                              # (Bt, Hp) f32

    o1 = conv_relu_max(0, 2, b1_ref)
    o2 = conv_relu_max(2, 3, b2_ref)
    o3 = conv_relu_max(5, 4, b3_ref)

    # TextCNN.fc on concat([o1, o2, o3]) expressed as split matmuls (bf16 operands).
    cnn = (jnp.dot(o1.astype(jnp.bfloat16), wfc1_ref[...], preferred_element_type=jnp.float32)
           + jnp.dot(o2.astype(jnp.bfloat16), wfc2_ref[...], preferred_element_type=jnp.float32)
           + jnp.dot(o3.astype(jnp.bfloat16), wfc3_ref[...], preferred_element_type=jnp.float32)
           + bfc_ref[...])

    # classifier on concat([pooled, cnn]) as split matmuls (dropout = identity).
    pooled = pooled_ref[...].reshape(Bt, Hp)
    logits = (jnp.dot(pooled, wcp_ref[...], preferred_element_type=jnp.float32)
              + jnp.dot(cnn.astype(jnp.bfloat16), wcc_ref[...], preferred_element_type=jnp.float32)
              + bc_ref[...])
    out_ref[...] = logits.reshape(Bt, 1, Cp).astype(out_ref.dtype)


def mymodel_head(hidden_states, pooled_output, params):
    """hidden_states: (B, S, H) f32, pooled_output: (B, H) f32 -> logits (B, C) f32."""
    B, S, H = hidden_states.shape
    C = params["bc"].shape[-1]
    assert S >= 3, "TextCNN conv3 (kernel_size=4, padding=1) needs seq_len >= 3"

    Hp = _round_up(H, 128)        # lane-pad hidden dim (no-op for BERT's H=768)
    Cp = _round_up(C, 128)        # lane-pad logits so the store path is unmasked
    Spad = _round_up(S + 1, 16)   # x rows + 1 zero tail row, 16-aligned (bf16 sublanes)

    # ---- weight prep (done once at load time in a real deployment) -------------------
    def pad2(a, r, c):
        return jnp.pad(a, ((0, r - a.shape[0]), (0, c - a.shape[1])))

    taps = []
    for name, k in (("w1", 2), ("w2", 3), ("w3", 4)):
        w = params[name]
        taps += [pad2(w[j], Hp, Hp) for j in range(k)]
    w_all = jnp.concatenate(taps, axis=1).astype(jnp.bfloat16)        # (Hp, 9*Hp)

    b1 = pad2(params["b1"], 1, Hp).astype(jnp.float32)
    b2 = pad2(params["b2"], 1, Hp).astype(jnp.float32)
    b3 = pad2(params["b3"], 1, Hp).astype(jnp.float32)
    wfc1 = pad2(params["wfc1"], Hp, Cp).astype(jnp.bfloat16)
    wfc2 = pad2(params["wfc2"], Hp, Cp).astype(jnp.bfloat16)
    wfc3 = pad2(params["wfc3"], Hp, Cp).astype(jnp.bfloat16)
    bfc = pad2(params["bfc"], 1, Cp).astype(jnp.float32)
    wcp = pad2(params["wcp"], Hp, Cp).astype(jnp.bfloat16)
    wcc = pad2(params["wcc"], Cp, Cp).astype(jnp.bfloat16)
    bc = pad2(params["bc"], 1, Cp).astype(jnp.float32)

    # ---- batch tile: keep the per-tile f32 projection (+ buffers) under ~20 MiB ------
    per_row = Spad * 9 * Hp * 4 + Spad * Hp * 2 + 2 * S * Hp * 2
    B_tile = int(max(1, min(B, 16, (20 * 2 ** 20) // per_row)))
    B_pad = _round_up(B, B_tile)
    nb = B_pad // B_tile

    # ---- activation prep: bf16 operands halve HBM->VMEM DMA bytes --------------------
    x = jnp.pad(hidden_states, ((0, B_pad - B), (0, 0), (0, Hp - H))).astype(jnp.bfloat16)
    pooled = jnp.pad(pooled_output, ((0, B_pad - B), (0, Hp - H)))
    pooled = pooled.reshape(B_pad, 1, Hp).astype(jnp.bfloat16)

    const2 = lambda i: (0, 0)
    in_specs = [
        pl.BlockSpec((B_tile, S, Hp), lambda i: (i, 0, 0)),   # x: tiled over batch
        pl.BlockSpec((B_tile, 1, Hp), lambda i: (i, 0, 0)),   # pooled
        pl.BlockSpec(w_all.shape, const2),                    # weights stay resident
        pl.BlockSpec(b1.shape, const2),
        pl.BlockSpec(b2.shape, const2),
        pl.BlockSpec(b3.shape, const2),
        pl.BlockSpec(wfc1.shape, const2),
        pl.BlockSpec(wfc2.shape, const2),
        pl.BlockSpec(wfc3.shape, const2),
        pl.BlockSpec(bfc.shape, const2),
        pl.BlockSpec(wcp.shape, const2),
        pl.BlockSpec(wcc.shape, const2),
        pl.BlockSpec(bc.shape, const2),
    ]
    out_specs = pl.BlockSpec((B_tile, 1, Cp), lambda i: (i, 0, 0))

    def nbytes(a):
        return int(a.size) * a.dtype.itemsize

    w_bytes = sum(nbytes(a) for a in (w_all, b1, b2, b3, wfc1, wfc2, wfc3, bfc, wcp, wcc, bc))
    act_bytes = nbytes(x) + nbytes(pooled) + B_pad * Cp * 4
    flops = (2 * B_pad * Spad * Hp * 9 * Hp
             + 2 * B_pad * (3 * Hp * Cp + Hp * Cp + Cp * Cp))
    cost = pl.CostEstimate(flops=int(flops), transcendentals=0,
                           bytes_accessed=int(w_bytes + act_bytes))

    tile_act = B_tile * S * Hp * 2 + B_tile * Hp * 2 + B_tile * Cp * 4
    vmem_est = (2 * tile_act                       # double-buffered act/out tiles
                + 2 * w_bytes                      # resident weight buffers
                + B_tile * Spad * Hp * 2           # xpad scratch (bf16)
                + 2 * B_tile * Spad * 9 * Hp * 4)  # projection + conv temporaries (f32)
    vmem_limit = int(min(48 * 2 ** 20, max(16 * 2 ** 20, (vmem_est * 3) // 2)))

    out = pl.pallas_call(
        _textcnn_head_kernel,
        out_shape=jax.ShapeDtypeStruct((B_pad, 1, Cp), jnp.float32),
        grid=(nb,),
        in_specs=in_specs,
        out_specs=out_specs,
        scratch_shapes=[pltpu.VMEM((B_tile, Spad, Hp), jnp.bfloat16)],
        compiler_params=pltpu.CompilerParams(
            dimension_semantics=("parallel",),
            vmem_limit_bytes=vmem_limit),
        cost_estimate=cost,
    )(x, pooled, w_all, b1, b2, b3, wfc1, wfc2, wfc3, bfc, wcp, wcc, bc)

    return out[:B, 0, :C]


def init_params(key, H, C):
    """Deterministic synthetic weights.  Conv weights stored as (k, H_in, H_out)
    (torch's (H_out, H_in, k) transposed); linear weights stored transposed
    (in_features, out_features) and pre-split along the concat axis."""
    ks = jax.random.split(key, 12)
    s = 0.05
    return {
        "w1": jax.random.normal(ks[0], (2, H, H), jnp.float32) * s,
        "b1": jax.random.normal(ks[1], (1, H), jnp.float32) * s,
        "w2": jax.random.normal(ks[2], (3, H, H), jnp.float32) * s,
        "b2": jax.random.normal(ks[3], (1, H), jnp.float32) * s,
        "w3": jax.random.normal(ks[4], (4, H, H), jnp.float32) * s,
        "b3": jax.random.normal(ks[5], (1, H), jnp.float32) * s,
        # TextCNN.fc: Linear(3H, C) split into 3 blocks of (H, C)
        "wfc1": jax.random.normal(ks[6], (H, C), jnp.float32) * s,
        "wfc2": jax.random.normal(ks[7], (H, C), jnp.float32) * s,
        "wfc3": jax.random.normal(ks[8], (H, C), jnp.float32) * s,
        "bfc": jax.random.normal(ks[9], (1, C), jnp.float32) * s,
        # classifier: Linear(H + C, C) split into (H, C) and (C, C)
        "wcp": jax.random.normal(ks[10], (H, C), jnp.float32) * s,
        "wcc": jax.random.normal(ks[11], (C, C), jnp.float32) * s,
        "bc": jnp.zeros((1, C), jnp.float32),
    }


def _reference(hidden_states, pooled_output, params):
    """Pure-JAX f32 reference mirroring the PyTorch forward (NCW conv semantics)."""
    xp = jnp.pad(hidden_states, ((0, 0), (1, 1), (0, 0)))  # (B, S+2, H)

    def conv(w, b, k):
        L = xp.shape[1] - k + 1
        acc = sum(jnp.einsum("bld,de->ble", xp[:, j:j + L, :], w[j]) for j in range(k))
        acc = jnp.maximum(acc + b[None], 0.0)
        return jnp.max(acc, axis=1)

    o1 = conv(params["w1"], params["b1"], 2)
    o2 = conv(params["w2"], params["b2"], 3)
    o3 = conv(params["w3"], params["b3"], 4)
    cnn = o1 @ params["wfc1"] + o2 @ params["wfc2"] + o3 @ params["wfc3"] + params["bfc"]
    return pooled_output @ params["wcp"] + cnn @ params["wcc"] + params["bc"]


if __name__ == "__main__":
    B, S, H, C = 2, 8, 32, 2   # batch, seq, hidden_size, num_labels
    key = jax.random.PRNGKey(0)
    k_h, k_p, k_w = jax.random.split(key, 3)
    hidden_states = jax.random.normal(k_h, (B, S, H), jnp.float32)   # last_hidden_state
    pooled_output = jax.random.normal(k_p, (B, H), jnp.float32)      # pooler_output
    params = init_params(k_w, H, C)

    logits = mymodel_head(hidden_states, pooled_output, params)
    logits = jax.block_until_ready(logits)

    ref = _reference(hidden_states, pooled_output, params)
    assert logits.shape == (B, C)
    # bf16 matmul operands (f32 accumulation) -> loosened tolerance vs f32 reference
    assert jnp.allclose(logits, ref, atol=2e-2, rtol=2e-2), (
        "mismatch vs reference, max abs err = "
        f"{float(jnp.max(jnp.abs(logits - ref)))}")
    print("KERNEL_OK")
</pallas_src>

<mosaic_0001>
module attributes {stable_mosaic.version = 11 : i64} {
  func.func @_textcnn_head_kernel(%arg0: i32, %arg1: memref<2x8x128xbf16, #tpu.memory_space<vmem>>, %arg2: memref<2x1x128xbf16, #tpu.memory_space<vmem>>, %arg3: memref<128x1152xbf16, #tpu.memory_space<vmem>>, %arg4: memref<1x128xf32, #tpu.memory_space<vmem>>, %arg5: memref<1x128xf32, #tpu.memory_space<vmem>>, %arg6: memref<1x128xf32, #tpu.memory_space<vmem>>, %arg7: memref<128x128xbf16, #tpu.memory_space<vmem>>, %arg8: memref<128x128xbf16, #tpu.memory_space<vmem>>, %arg9: memref<128x128xbf16, #tpu.memory_space<vmem>>, %arg10: memref<1x128xf32, #tpu.memory_space<vmem>>, %arg11: memref<128x128xbf16, #tpu.memory_space<vmem>>, %arg12: memref<128x128xbf16, #tpu.memory_space<vmem>>, %arg13: memref<1x128xf32, #tpu.memory_space<vmem>>, %arg14: memref<2x1x128xf32, #tpu.memory_space<vmem>>, %arg15: memref<2x16x128xbf16, #tpu.memory_space<vmem>>) attributes {dimension_semantics = [#tpu.dimension_semantics<parallel>], iteration_bounds = array<i64: 1>, scalar_prefetch = 0 : i64, scratch_operands = 1 : i64, tpu.core_type = #tpu.core_type<tc>, window_params = [{transform_indices = @transform_0, window_bounds = array<i64: 2, 8, 128>}, {transform_indices = @transform_1, window_bounds = array<i64: 2, 1, 128>}, {pipeline_mode = #tpu.pipeline_mode<synchronous>, transform_indices = @transform_2, window_bounds = array<i64: 128, 1152>}, {pipeline_mode = #tpu.pipeline_mode<synchronous>, transform_indices = @transform_3, window_bounds = array<i64: 1, 128>}, {pipeline_mode = #tpu.pipeline_mode<synchronous>, transform_indices = @transform_4, window_bounds = array<i64: 1, 128>}, {pipeline_mode = #tpu.pipeline_mode<synchronous>, transform_indices = @transform_5, window_bounds = array<i64: 1, 128>}, {pipeline_mode = #tpu.pipeline_mode<synchronous>, transform_indices = @transform_6, window_bounds = array<i64: 128, 128>}, {pipeline_mode = #tpu.pipeline_mode<synchronous>, transform_indices = @transform_7, window_bounds = array<i64: 128, 128>}, {pipeline_mode = #tpu.pipeline_mode<synchronous>, transform_indices = @transform_8, window_bounds = array<i64: 128, 128>}, {pipeline_mode = #tpu.pipeline_mode<synchronous>, transform_indices = @transform_9, window_bounds = array<i64: 1, 128>}, {pipeline_mode = #tpu.pipeline_mode<synchronous>, transform_indices = @transform_10, window_bounds = array<i64: 128, 128>}, {pipeline_mode = #tpu.pipeline_mode<synchronous>, transform_indices = @transform_11, window_bounds = array<i64: 128, 128>}, {pipeline_mode = #tpu.pipeline_mode<synchronous>, transform_indices = @transform_12, window_bounds = array<i64: 1, 128>}, {transform_indices = @transform_13, window_bounds = array<i64: 2, 1, 128>}]} {
    %cst = arith.constant 0.000000e+00 : bf16
    %0 = vector.broadcast %cst : bf16 to vector<2x16x128xbf16>
    %c0 = arith.constant 0 : index
    %c0_0 = arith.constant 0 : index
    %c0_1 = arith.constant 0 : index
    %1 = vector.load %arg15[%c0, %c0_0, %c0_1] : memref<2x16x128xbf16, #tpu.memory_space<vmem>>, vector<2x16x128xbf16>
    tpu.vector_store %arg15[%c0, %c0_0, %c0_1], %0 {strides = array<i32>} : memref<2x16x128xbf16, #tpu.memory_space<vmem>>, vector<2x16x128xbf16>,
    %c0_2 = arith.constant 0 : index
    %c0_3 = arith.constant 0 : index
    %c0_4 = arith.constant 0 : index
    %2 = vector.load %arg1[%c0_2, %c0_3, %c0_4] : memref<2x8x128xbf16, #tpu.memory_space<vmem>>, vector<2x8x128xbf16>
    %c0_5 = arith.constant 0 : index
    %c0_6 = arith.constant 0 : index
    %c0_7 = arith.constant 0 : index
    %3 = vector.load %arg15[%c0_5, %c0_6, %c0_7] : memref<2x16x128xbf16, #tpu.memory_space<vmem>>, vector<2x8x128xbf16>
    tpu.vector_store %arg15[%c0_5, %c0_6, %c0_7], %2 {strides = array<i32>} : memref<2x16x128xbf16, #tpu.memory_space<vmem>>, vector<2x8x128xbf16>,
    %c0_8 = arith.constant 0 : index
    %c0_9 = arith.constant 0 : index
    %c0_10 = arith.constant 0 : index
    %4 = vector.load %arg15[%c0_8, %c0_9, %c0_10] : memref<2x16x128xbf16, #tpu.memory_space<vmem>>, vector<2x16x128xbf16>
    %5 = vector.shape_cast %4 : vector<2x16x128xbf16> to vector<32x128xbf16>
    %c0_11 = arith.constant 0 : index
    %c0_12 = arith.constant 0 : index
    %6 = vector.load %arg3[%c0_11, %c0_12] : memref<128x1152xbf16, #tpu.memory_space<vmem>>, vector<128x1152xbf16>
    %cst_13 = arith.constant dense<0.000000e+00> : vector<32x1152xf32>
    %7 = tpu.matmul %5, %6, %cst_13 {dimension_numbers = #tpu.dot_dimension_numbers<[1], [0], [0], [1], [0, 0, 1, 1], [], []>} : vector<32x128xbf16>, vector<128x1152xbf16>, vector<32x1152xf32> -> vector<32x1152xf32>
    %8 = vector.shape_cast %7 : vector<32x1152xf32> to vector<2x16x1152xf32>
    %c0_14 = arith.constant 0 : index
    %c0_15 = arith.constant 0 : index
    %9 = vector.load %arg4[%c0_14, %c0_15] : memref<1x128xf32, #tpu.memory_space<vmem>>, vector<1x128xf32>
    %10 = vector.shape_cast %9 : vector<1x128xf32> to vector<1x1x128xf32>
    %11 = vector.extract_strided_slice %8 {offsets = [0, 0, 0], sizes = [2, 8, 128], strides = [1, 1, 1]} : vector<2x16x1152xf32> to vector<2x8x128xf32>
    %12 = vector.extract_strided_slice %8 {offsets = [0, 1, 128], sizes = [2, 8, 128], strides = [1, 1, 1]} : vector<2x16x1152xf32> to vector<2x8x128xf32>
    %13 = arith.addf %11, %12 : vector<2x8x128xf32>
    %14 = vector.broadcast %10 : vector<1x1x128xf32> to vector<2x8x128xf32>
    %15 = arith.addf %13, %14 : vector<2x8x128xf32>
    %cst_16 = arith.constant 0.000000e+00 : f32
    %16 = vector.broadcast %cst_16 : f32 to vector<2x8x128xf32>
    %17 = arith.maximumf %15, %16 : vector<2x8x128xf32>
    %cst_17 = arith.constant dense<0xFF800000> : vector<2x128xf32>
    %18 = vector.multi_reduction <maximumf>, %17, %cst_17 [1] : vector<2x8x128xf32> to vector<2x128xf32>
    %19 = vector.extract_strided_slice %8 {offsets = [0, 0, 128], sizes = [2, 1, 128], strides = [1, 1, 1]} : vector<2x16x1152xf32> to vector<2x1x128xf32>
    %20 = vector.broadcast %10 : vector<1x1x128xf32> to vector<2x1x128xf32>
    %21 = arith.addf %19, %20 : vector<2x1x128xf32>
    %cst_18 = arith.constant 0.000000e+00 : f32
    %22 = vector.broadcast %cst_18 : f32 to vector<2x1x128xf32>
    %23 = arith.maximumf %21, %22 : vector<2x1x128xf32>
    %cst_19 = arith.constant dense<0xFF800000> : vector<2x128xf32>
    %24 = vector.multi_reduction <maximumf>, %23, %cst_19 [1] : vector<2x1x128xf32> to vector<2x128xf32>
    %25 = arith.maximumf %18, %24 : vector<2x128xf32>
    %c0_20 = arith.constant 0 : index
    %c0_21 = arith.constant 0 : index
    %26 = vector.load %arg5[%c0_20, %c0_21] : memref<1x128xf32, #tpu.memory_space<vmem>>, vector<1x128xf32>
    %27 = vector.shape_cast %26 : vector<1x128xf32> to vector<1x1x128xf32>
    %28 = vector.extract_strided_slice %8 {offsets = [0, 0, 256], sizes = [2, 7, 128], strides = [1, 1, 1]} : vector<2x16x1152xf32> to vector<2x7x128xf32>
    %29 = vector.extract_strided_slice %8 {offsets = [0, 1, 384], sizes = [2, 7, 128], strides = [1, 1, 1]} : vector<2x16x1152xf32> to vector<2x7x128xf32>
    %30 = arith.addf %28, %29 : vector<2x7x128xf32>
    %31 = vector.extract_strided_slice %8 {offsets = [0, 2, 512], sizes = [2, 7, 128], strides = [1, 1, 1]} : vector<2x16x1152xf32> to vector<2x7x128xf32>
    %32 = arith.addf %30, %31 : vector<2x7x128xf32>
    %33 = vector.broadcast %27 : vector<1x1x128xf32> to vector<2x7x128xf32>
    %34 = arith.addf %32, %33 : vector<2x7x128xf32>
    %cst_22 = arith.constant 0.000000e+00 : f32
    %35 = vector.broadcast %cst_22 : f32 to vector<2x7x128xf32>
    %36 = arith.maximumf %34, %35 : vector<2x7x128xf32>
    %cst_23 = arith.constant dense<0xFF800000> : vector<2x128xf32>
    %37 = vector.multi_reduction <maximumf>, %36, %cst_23 [1] : vector<2x7x128xf32> to vector<2x128xf32>
    %38 = vector.extract_strided_slice %8 {offsets = [0, 0, 384], sizes = [2, 1, 128], strides = [1, 1, 1]} : vector<2x16x1152xf32> to vector<2x1x128xf32>
    %39 = vector.extract_strided_slice %8 {offsets = [0, 1, 512], sizes = [2, 1, 128], strides = [1, 1, 1]} : vector<2x16x1152xf32> to vector<2x1x128xf32>
    %40 = arith.addf %38, %39 : vector<2x1x128xf32>
    %41 = vector.broadcast %27 : vector<1x1x128xf32> to vector<2x1x128xf32>
    %42 = arith.addf %40, %41 : vector<2x1x128xf32>
    %cst_24 = arith.constant 0.000000e+00 : f32
    %43 = vector.broadcast %cst_24 : f32 to vector<2x1x128xf32>
    %44 = arith.maximumf %42, %43 : vector<2x1x128xf32>
    %cst_25 = arith.constant dense<0xFF800000> : vector<2x128xf32>
    %45 = vector.multi_reduction <maximumf>, %44, %cst_25 [1] : vector<2x1x128xf32> to vector<2x128xf32>
    %46 = arith.maximumf %37, %45 : vector<2x128xf32>
    %c0_26 = arith.constant 0 : index
    %c0_27 = arith.constant 0 : index
    %47 = vector.load %arg6[%c0_26, %c0_27] : memref<1x128xf32, #tpu.memory_space<vmem>>, vector<1x128xf32>
    %48 = vector.shape_cast %47 : vector<1x128xf32> to vector<1x1x128xf32>
    %49 = vector.extract_strided_slice %8 {offsets = [0, 0, 640], sizes = [2, 6, 128], strides = [1, 1, 1]} : vector<2x16x1152xf32> to vector<2x6x128xf32>
    %50 = vector.extract_strided_slice %8 {offsets = [0, 1, 768], sizes = [2, 6, 128], strides = [1, 1, 1]} : vector<2x16x1152xf32> to vector<2x6x128xf32>
    %51 = arith.addf %49, %50 : vector<2x6x128xf32>
    %52 = vector.extract_strided_slice %8 {offsets = [0, 2, 896], sizes = [2, 6, 128], strides = [1, 1, 1]} : vector<2x16x1152xf32> to vector<2x6x128xf32>
    %53 = arith.addf %51, %52 : vector<2x6x128xf32>
    %54 = vector.extract_strided_slice %8 {offsets = [0, 3, 1024], sizes = [2, 6, 128], strides = [1, 1, 1]} : vector<2x16x1152xf32> to vector<2x6x128xf32>
    %55 = arith.addf %53, %54 : vector<2x6x128xf32>
    %56 = vector.broadcast %48 : vector<1x1x128xf32> to vector<2x6x128xf32>
    %57 = arith.addf %55, %56 : vector<2x6x128xf32>
    %cst_28 = arith.constant 0.000000e+00 : f32
    %58 = vector.broadcast %cst_28 : f32 to vector<2x6x128xf32>
    %59 = arith.maximumf %57, %58 : vector<2x6x128xf32>
    %cst_29 = arith.constant dense<0xFF800000> : vector<2x128xf32>
    %60 = vector.multi_reduction <maximumf>, %59, %cst_29 [1] : vector<2x6x128xf32> to vector<2x128xf32>
    %61 = vector.extract_strided_slice %8 {offsets = [0, 0, 768], sizes = [2, 1, 128], strides = [1, 1, 1]} : vector<2x16x1152xf32> to vector<2x1x128xf32>
    %62 = vector.extract_strided_slice %8 {offsets = [0, 1, 896], sizes = [2, 1, 128], strides = [1, 1, 1]} : vector<2x16x1152xf32> to vector<2x1x128xf32>
    %63 = arith.addf %61, %62 : vector<2x1x128xf32>
    %64 = vector.extract_strided_slice %8 {offsets = [0, 2, 1024], sizes = [2, 1, 128], strides = [1, 1, 1]} : vector<2x16x1152xf32> to vector<2x1x128xf32>
    %65 = arith.addf %63, %64 : vector<2x1x128xf32>
    %66 = vector.broadcast %48 : vector<1x1x128xf32> to vector<2x1x128xf32>
    %67 = arith.addf %65, %66 : vector<2x1x128xf32>
    %cst_30 = arith.constant 0.000000e+00 : f32
    %68 = vector.broadcast %cst_30 : f32 to vector<2x1x128xf32>
    %69 = arith.maximumf %67, %68 : vector<2x1x128xf32>
    %cst_31 = arith.constant dense<0xFF800000> : vector<2x128xf32>
    %70 = vector.multi_reduction <maximumf>, %69, %cst_31 [1] : vector<2x1x128xf32> to vector<2x128xf32>
    %71 = arith.maximumf %60, %70 : vector<2x128xf32>
    %72 = arith.truncf %25 : vector<2x128xf32> to vector<2x128xbf16>
    %c0_32 = arith.constant 0 : index
    %c0_33 = arith.constant 0 : index
    %73 = vector.load %arg7[%c0_32, %c0_33] : memref<128x128xbf16, #tpu.memory_space<vmem>>, vector<128x128xbf16>
    %cst_34 = arith.constant dense<0.000000e+00> : vector<2x128xf32>
    %74 = tpu.matmul %72, %73, %cst_34 {dimension_numbers = #tpu.dot_dimension_numbers<[1], [0], [0], [1], [0, 0, 1, 1], [], []>} : vector<2x128xbf16>, vector<128x128xbf16>, vector<2x128xf32> -> vector<2x128xf32>
    %75 = arith.truncf %46 : vector<2x128xf32> to vector<2x128xbf16>
    %c0_35 = arith.constant 0 : index
    %c0_36 = arith.constant 0 : index
    %76 = vector.load %arg8[%c0_35, %c0_36] : memref<128x128xbf16, #tpu.memory_space<vmem>>, vector<128x128xbf16>
    %cst_37 = arith.constant dense<0.000000e+00> : vector<2x128xf32>
    %77 = tpu.matmul %75, %76, %cst_37 {dimension_numbers = #tpu.dot_dimension_numbers<[1], [0], [0], [1], [0, 0, 1, 1], [], []>} : vector<2x128xbf16>, vector<128x128xbf16>, vector<2x128xf32> -> vector<2x128xf32>
    %78 = arith.addf %74, %77 : vector<2x128xf32>
    %79 = arith.truncf %71 : vector<2x128xf32> to vector<2x128xbf16>
    %c0_38 = arith.constant 0 : index
    %c0_39 = arith.constant 0 : index
    %80 = vector.load %arg9[%c0_38, %c0_39] : memref<128x128xbf16, #tpu.memory_space<vmem>>, vector<128x128xbf16>
    %cst_40 = arith.constant dense<0.000000e+00> : vector<2x128xf32>
    %81 = tpu.matmul %79, %80, %cst_40 {dimension_numbers = #tpu.dot_dimension_numbers<[1], [0], [0], [1], [0, 0, 1, 1], [], []>} : vector<2x128xbf16>, vector<128x128xbf16>, vector<2x128xf32> -> vector<2x128xf32>
    %82 = arith.addf %78, %81 : vector<2x128xf32>
    %c0_41 = arith.constant 0 : index
    %c0_42 = arith.constant 0 : index
    %83 = vector.load %arg10[%c0_41, %c0_42] : memref<1x128xf32, #tpu.memory_space<vmem>>, vector<1x128xf32>
    %84 = vector.broadcast %83 : vector<1x128xf32> to vector<2x128xf32>
    %85 = arith.addf %82, %84 : vector<2x128xf32>
    %c0_43 = arith.constant 0 : index
    %c0_44 = arith.constant 0 : index
    %c0_45 = arith.constant 0 : index
    %86 = vector.load %arg2[%c0_43, %c0_44, %c0_45] : memref<2x1x128xbf16, #tpu.memory_space<vmem>>, vector<2x1x128xbf16>
    %87 = vector.shape_cast %86 : vector<2x1x128xbf16> to vector<2x128xbf16>
    %c0_46 = arith.constant 0 : index
    %c0_47 = arith.constant 0 : index
    %88 = vector.load %arg11[%c0_46, %c0_47] : memref<128x128xbf16, #tpu.memory_space<vmem>>, vector<128x128xbf16>
    %cst_48 = arith.constant dense<0.000000e+00> : vector<2x128xf32>
    %89 = tpu.matmul %87, %88, %cst_48 {dimension_numbers = #tpu.dot_dimension_numbers<[1], [0], [0], [1], [0, 0, 1, 1], [], []>} : vector<2x128xbf16>, vector<128x128xbf16>, vector<2x128xf32> -> vector<2x128xf32>
    %90 = arith.truncf %85 : vector<2x128xf32> to vector<2x128xbf16>
    %c0_49 = arith.constant 0 : index
    %c0_50 = arith.constant 0 : index
    %91 = vector.load %arg12[%c0_49, %c0_50] : memref<128x128xbf16, #tpu.memory_space<vmem>>, vector<128x128xbf16>
    %cst_51 = arith.constant dense<0.000000e+00> : vector<2x128xf32>
    %92 = tpu.matmul %90, %91, %cst_51 {dimension_numbers = #tpu.dot_dimension_numbers<[1], [0], [0], [1], [0, 0, 1, 1], [], []>} : vector<2x128xbf16>, vector<128x128xbf16>, vector<2x128xf32> -> vector<2x128xf32>
    %93 = arith.addf %89, %92 : vector<2x128xf32>
    %c0_52 = arith.constant 0 : index
    %c0_53 = arith.constant 0 : index
    %94 = vector.load %arg13[%c0_52, %c0_53] : memref<1x128xf32, #tpu.memory_space<vmem>>, vector<1x128xf32>
    %95 = vector.broadcast %94 : vector<1x128xf32> to vector<2x128xf32>
    %96 = arith.addf %93, %95 : vector<2x128xf32>
    %97 = vector.shape_cast %96 : vector<2x128xf32> to vector<2x1x128xf32>
    %c0_54 = arith.constant 0 : index
    %c0_55 = arith.constant 0 : index
    %c0_56 = arith.constant 0 : index
    %98 = vector.load %arg14[%c0_54, %c0_55, %c0_56] : memref<2x1x128xf32, #tpu.memory_space<vmem>>, vector<2x1x128xf32>
    tpu.vector_store %arg14[%c0_54, %c0_55, %c0_56], %97 {strides = array<i32>} : memref<2x1x128xf32, #tpu.memory_space<vmem>>, vector<2x1x128xf32>,
    return
  }
  func.func @transform_0(%arg0: i32) -> (i32, i32, i32) {
    %c0_i32 = arith.constant 0 : i32
    %c0_i32_0 = arith.constant 0 : i32
    %c0_i32_1 = arith.constant 0 : i32
    return %arg0, %c0_i32, %c0_i32_0 : i32, i32, i32
  }
  func.func @transform_1(%arg0: i32) -> (i32, i32, i32) {
    %c0_i32 = arith.constant 0 : i32
    %c0_i32_0 = arith.constant 0 : i32
    %c0_i32_1 = arith.constant 0 : i32
    return %arg0, %c0_i32, %c0_i32_0 : i32, i32, i32
  }
  func.func @transform_2(%arg0: i32) -> (i32, i32) {
    %c0_i32 = arith.constant 0 : i32
    %c0_i32_0 = arith.constant 0 : i32
    %c0_i32_1 = arith.constant 0 : i32
    return %c0_i32, %c0_i32_0 : i32, i32
  }
  func.func @transform_3(%arg0: i32) -> (i32, i32) {
    %c0_i32 = arith.constant 0 : i32
    %c0_i32_0 = arith.constant 0 : i32
    %c0_i32_1 = arith.constant 0 : i32
    return %c0_i32, %c0_i32_0 : i32, i32
  }
  func.func @transform_4(%arg0: i32) -> (i32, i32) {
    %c0_i32 = arith.constant 0 : i32
    %c0_i32_0 = arith.constant 0 : i32
    %c0_i32_1 = arith.constant 0 : i32
    return %c0_i32, %c0_i32_0 : i32, i32
  }
  func.func @transform_5(%arg0: i32) -> (i32, i32) {
    %c0_i32 = arith.constant 0 : i32
    %c0_i32_0 = arith.constant 0 : i32
    %c0_i32_1 = arith.constant 0 : i32
    return %c0_i32, %c0_i32_0 : i32, i32
  }
  func.func @transform_6(%arg0: i32) -> (i32, i32) {
    %c0_i32 = arith.constant 0 : i32
    %c0_i32_0 = arith.constant 0 : i32
    %c0_i32_1 = arith.constant 0 : i32
    return %c0_i32, %c0_i32_0 : i32, i32
  }
  func.func @transform_7(%arg0: i32) -> (i32, i32) {
    %c0_i32 = arith.constant 0 : i32
    %c0_i32_0 = arith.constant 0 : i32
    %c0_i32_1 = arith.constant 0 : i32
    return %c0_i32, %c0_i32_0 : i32, i32
  }
  func.func @transform_8(%arg0: i32) -> (i32, i32) {
    %c0_i32 = arith.constant 0 : i32
    %c0_i32_0 = arith.constant 0 : i32
    %c0_i32_1 = arith.constant 0 : i32
    return %c0_i32, %c0_i32_0 : i32, i32
  }
  func.func @transform_9(%arg0: i32) -> (i32, i32) {
    %c0_i32 = arith.constant 0 : i32
    %c0_i32_0 = arith.constant 0 : i32
    %c0_i32_1 = arith.constant 0 : i32
    return %c0_i32, %c0_i32_0 : i32, i32
  }
  func.func @transform_10(%arg0: i32) -> (i32, i32) {
    %c0_i32 = arith.constant 0 : i32
    %c0_i32_0 = arith.constant 0 : i32
    %c0_i32_1 = arith.constant 0 : i32
    return %c0_i32, %c0_i32_0 : i32, i32
  }
  func.func @transform_11(%arg0: i32) -> (i32, i32) {
    %c0_i32 = arith.constant 0 : i32
    %c0_i32_0 = arith.constant 0 : i32
    %c0_i32_1 = arith.constant 0 : i32
    return %c0_i32, %c0_i32_0 : i32, i32
  }
  func.func @transform_12(%arg0: i32) -> (i32, i32) {
    %c0_i32 = arith.constant 0 : i32
    %c0_i32_0 = arith.constant 0 : i32
    %c0_i32_1 = arith.constant 0 : i32
    return %c0_i32, %c0_i32_0 : i32, i32
  }
  func.func @transform_13(%arg0: i32) -> (i32, i32, i32) {
    %c0_i32 = arith.constant 0 : i32
    %c0_i32_0 = arith.constant 0 : i32
    %c0_i32_1 = arith.constant 0 : i32
    return %arg0, %c0_i32, %c0_i32_0 : i32, i32, i32
  }
}

</mosaic_0001>

<bundles_post_ra>
// kernel: tpu_custom_call.1
= control target key start
LH: loop header
LB: loop body
LE: loop exit
PB: predicated region body
PF: predicated region fallthrough
CT: control target
= control target key end

     0   :  { %18 = vsyncpa [#allocation4], 0  ;;  %s2662_s0 = inlined_call_operand.hbm [shape: bf16[2,8,128], index: 0, kind: input, shape index: {}]   ;;  %s2663_s1 = inlined_call_operand.vmem [shape: bf16[2,1,128], index: 1, kind: input, shape index: {}]   ;;  %s2664_s2 = inlined_call_operand.hbm [shape: bf16[128,1152], index: 2, kind: input, shape index: {}]   ;;  %s2665_s3 = inlined_call_operand.vmem [shape: f32[1,128], index: 3, kind: input, shape index: {}]   ;;  %s2666_s4 = inlined_call_operand.vmem [shape: f32[1,128], index: 4, kind: input, shape index: {}]   ;;  %s2667_s5 = inlined_call_operand.vmem [shape: f32[1,128], index: 5, kind: input, shape index: {}]   ;;  %s2668_s6 = inlined_call_operand.hbm [shape: bf16[128,128], index: 6, kind: input, shape index: {}]   ;;  %s2669_s7 = inlined_call_operand.hbm [shape: bf16[128,128], index: 7, kind: input, shape index: {}]   ;;  %s2670_s8 = inlined_call_operand.hbm [shape: bf16[128,128], index: 8, kind: input, shape index: {}]   ;;  %s2671_s9 = inlined_call_operand.vmem [shape: f32[1,128], index: 9, kind: input, shape index: {}]   ;;  %s2672_s10 = inlined_call_operand.hbm [shape: bf16[128,128], index: 10, kind: input, shape index: {}]   ;;  %s2673_s11 = inlined_call_operand.hbm [shape: bf16[128,128], index: 11, kind: input, shape index: {}]   ;;  %s2674_s12 = inlined_call_operand.vmem [shape: f32[1,128], index: 12, kind: input, shape index: {}]   ;;  %s2675_s13 = inlined_call_operand.hbm [shape: f32[2,1,128], index: 13, kind: output, shape index: {}]  }
   0x1   :  { %19 = vsyncpa [#allocation7], 0 }
   0x2   :  { %20 = vsyncpa [#allocation10], 0 }
   0x3   :  { %21 = vsyncpa [#allocation13], 0 }
   0x4   :  { %22 = vsyncpa [#allocation5], 0  ;;  %s2319_s25 = smov [#allocation6]   ;;  %s2133_s29 = scalar_lea.hbm %s2664_s2, 9216 }
   0x5   :  { %s42_s26 = sshll.u32 %s2319_s25, 4  ;;  %p2134_p0 = scmp.ne.s32.totalorder %s2664_s2, %s2133_s29  ;;  %s43_s26 = int_to_ptr.vmem [resolvable:$true] %s42_s26 }
   0x6   :  { %p2137_p1 = scmp.lt.u32.totalorder %s2133_s29, %s2664_s2 }
   0x8   :  { %p2139_p2 = pnand %p2137_p1, %p2134_p0 }
   0xa   :  { %2142 = shalt.err (!%p2139_p2)
}
   0xb   :  { %s2143_s17 = scalar_lea.vmem %s43_s26, 9216  ;;  %p2148_p4 = scmp.lt.s32.totalorder %s43_s26, %s43_s26 }
   0xc   :  { %p2144_p3 = scmp.ne.s32.totalorder %s43_s26, %s2143_s17  ;;  %p2149_p5 = scmp.lt.s32.totalorder %s2143_s17, %s2143_s17 }
   0xe   :  { %p2150_p6 = por %p2149_p5, %p2148_p4 }
  0x10   :  { %p2151_p7 = pnand %p2150_p6, %p2144_p3 }
  0x12   :  { %2154 = shalt.err (!%p2151_p7)
}
  0x13   :  { %s2320_s18 = smov 576   ;;  %s2321_s19 = smov 36  }
  0x14   :  { %48 = dma.hbm_to_vmem [thread:$0]  %s2664_s2, 9216, %s43_s26, [#allocation7], %s2320_s18, %s2320_s18, %s2321_s19  }
  0x15   :  { %s2322_s22 = smov [#allocation9]   ;;  %s2323_s24 = smov [#allocation12]  }
  0x16   :  { %s72_s23 = sshll.u32 %s2322_s22, 4  ;;  %s98_s25 = sshll.u32 %s2323_s24, 4  ;;  %s73_s23 = int_to_ptr.vmem [resolvable:$true] %s72_s23  ;;  %s99_s25 = int_to_ptr.vmem [resolvable:$true] %s98_s25 }
  0x17   :  { %s2155_s29 = scalar_lea.hbm %s2669_s7, 1024 }
  0x18   :  { %p2156_p8 = scmp.ne.s32.totalorder %s2669_s7, %s2155_s29  ;;  %p2159_p9 = scmp.lt.u32.totalorder %s2155_s29, %s2669_s7 }
  0x1a   :  { %p2161_p10 = pnand %p2159_p9, %p2156_p8 }
  0x1c   :  { %2164 = shalt.err (!%p2161_p10)
}
  0x1d   :  { %s2165_s2 = scalar_lea.vmem %s73_s23, 1024  ;;  %p2170_p12 = scmp.lt.s32.totalorder %s73_s23, %s73_s23 }
  0x1e   :  { %p2166_p11 = scmp.ne.s32.totalorder %s73_s23, %s2165_s2  ;;  %p2171_p13 = scmp.lt.s32.totalorder %s2165_s2, %s2165_s2 }
  0x20   :  { %p2172_p0 = por %p2171_p13, %p2170_p12 }
  0x22   :  { %p2173_p1 = pnand %p2172_p0, %p2166_p11 }
  0x24   :  { %2176 = shalt.err (!%p2173_p1)
}
  0x25   :  { %s2324_s26 = smov 64   ;;  %s2325_s17 = smov 4  }
  0x26   :  { %78 = dma.hbm_to_vmem [thread:$0]  %s2669_s7, 1024, %s73_s23, [#allocation10], %s2324_s26, %s2324_s26, %s2325_s17  }
  0x27   :  { %s2177_s22 = scalar_lea.hbm %s2672_s10, 1024 }
  0x28   :  { %p2178_p2 = scmp.ne.s32.totalorder %s2672_s10, %s2177_s22  ;;  %p2181_p3 = scmp.lt.u32.totalorder %s2177_s22, %s2672_s10 }
  0x2a   :  { %p2183_p4 = pnand %p2181_p3, %p2178_p2 }
  0x2c   :  { %2186 = shalt.err (!%p2183_p4)
}
  0x2d   :  { %s2187_s30 = scalar_lea.vmem %s99_s25, 1024  ;;  %p2192_p6 = scmp.lt.s32.totalorder %s99_s25, %s99_s25 }
  0x2e   :  { %p2188_p5 = scmp.ne.s32.totalorder %s99_s25, %s2187_s30  ;;  %p2193_p7 = scmp.lt.s32.totalorder %s2187_s30, %s2187_s30 }
  0x30   :  { %p2194_p8 = por %p2193_p7, %p2192_p6 }
  0x32   :  { %p2195_p9 = pnand %p2194_p8, %p2188_p5 }
  0x34   :  { %2198 = shalt.err (!%p2195_p9)
}
  0x35   :  { %104 = dma.hbm_to_vmem [thread:$0]  %s2672_s10, 1024, %s99_s25, [#allocation13], %s2324_s26, %s2324_s26, %s2325_s17  }
  0x36   :  { %s2326_s14 = smov [#allocation3]   ;;  %s2327_s16 = smov [#allocation8]  }
  0x37   :  { %s28_s15 = sshll.u32 %s2326_s14, 4  ;;  %s60_s2 = sshll.u32 %s2327_s16, 4  ;;  %s29_s15 = int_to_ptr.vmem [resolvable:$true] %s28_s15  ;;  %s61_s2 = int_to_ptr.vmem [resolvable:$true] %s60_s2 }
  0x38   :  { %s2199_s20 = scalar_lea.hbm %s2662_s0, 128 }
  0x39   :  { %p2200_p10 = scmp.ne.s32.totalorder %s2662_s0, %s2199_s20  ;;  %p2203_p11 = scmp.lt.u32.totalorder %s2199_s20, %s2662_s0 }
  0x3b   :  { %p2205_p12 = pnand %p2203_p11, %p2200_p10 }
  0x3d   :  { %2208 = shalt.err (!%p2205_p12)
}
  0x3e   :  { %s2209_s10 = scalar_lea.vmem %s29_s15, 128  ;;  %p2214_p0 = scmp.lt.s32.totalorder %s29_s15, %s29_s15 }
  0x3f   :  { %p2210_p13 = scmp.ne.s32.totalorder %s29_s15, %s2209_s10  ;;  %p2215_p1 = scmp.lt.s32.totalorder %s2209_s10, %s2209_s10 }
  0x41   :  { %p2216_p2 = por %p2215_p1, %p2214_p0 }
  0x43   :  { %p2217_p3 = pnand %p2216_p2, %p2210_p13 }
  0x45   :  { %2220 = shalt.err (!%p2217_p3)
}
  0x46   :  { %34 = dma.hbm_to_vmem [thread:$0]  %s2662_s0, 128, %s29_s15, [#allocation4], %s2324_s26, %s2324_s26, %s2325_s17  }
  0x47   :  { %s2221_s7 = scalar_lea.hbm %s2668_s6, 1024 }
  0x48   :  { %p2222_p4 = scmp.ne.s32.totalorder %s2668_s6, %s2221_s7  ;;  %p2225_p5 = scmp.lt.u32.totalorder %s2221_s7, %s2668_s6 }
  0x4a   :  { %p2227_p6 = pnand %p2225_p5, %p2222_p4 }
  0x4c   :  { %2230 = shalt.err (!%p2227_p6)
}
  0x4d   :  { %s2231_s19 = scalar_lea.vmem %s61_s2, 1024  ;;  %p2236_p8 = scmp.lt.s32.totalorder %s61_s2, %s61_s2 }
  0x4e   :  { %p2232_p7 = scmp.ne.s32.totalorder %s61_s2, %s2231_s19  ;;  %p2237_p9 = scmp.lt.s32.totalorder %s2231_s19, %s2231_s19 }
  0x50   :  { %p2238_p10 = por %p2237_p9, %p2236_p8 }
  0x52   :  { %p2239_p11 = pnand %p2238_p10, %p2232_p7 }
  0x54   :  { %2242 = shalt.err (!%p2239_p11)
}
  0x55   :  { %66 = dma.hbm_to_vmem [thread:$0]  %s2668_s6, 1024, %s61_s2, [#allocation7], %s2324_s26, %s2324_s26, %s2325_s17  }
  0x56   :  { %s2328_s20 = smov [#allocation11]   ;;  %s2329_s22 = smov [#allocation14]  }
  0x57   :  { %s84_s21 = sshll.u32 %s2328_s20, 4  ;;  %s110_s24 = sshll.u32 %s2329_s22, 4  ;;  %s85_s21 = int_to_ptr.vmem [resolvable:$true] %s84_s21  ;;  %s111_s24 = int_to_ptr.vmem [resolvable:$true] %s110_s24 }
  0x58   :  { %s2243_s25 = scalar_lea.hbm %s2670_s8, 1024 }
  0x59   :  { %p2244_p12 = scmp.ne.s32.totalorder %s2670_s8, %s2243_s25  ;;  %p2247_p13 = scmp.lt.u32.totalorder %s2243_s25, %s2670_s8 }
  0x5b   :  { %p2249_p0 = pnand %p2247_p13, %p2244_p12 }
  0x5d   :  { %2252 = shalt.err (!%p2249_p0)
}
  0x5e   :  { %s2253_s6 = scalar_lea.vmem %s85_s21, 1024  ;;  %p2258_p2 = scmp.lt.s32.totalorder %s85_s21, %s85_s21 }
  0x5f   :  { %p2254_p1 = scmp.ne.s32.totalorder %s85_s21, %s2253_s6  ;;  %p2259_p3 = scmp.lt.s32.totalorder %s2253_s6, %s2253_s6 }
  0x61   :  { %p2260_p4 = por %p2259_p3, %p2258_p2 }
  0x63   :  { %p2261_p5 = pnand %p2260_p4, %p2254_p1 }
  0x65   :  { %2264 = shalt.err (!%p2261_p5)
}
  0x66   :  { %90 = dma.hbm_to_vmem [thread:$0]  %s2670_s8, 1024, %s85_s21, [#allocation10], %s2324_s26, %s2324_s26, %s2325_s17  }
  0x67   :  { %s2265_s18 = scalar_lea.hbm %s2673_s11, 1024 }
  0x68   :  { %p2266_p6 = scmp.ne.s32.totalorder %s2673_s11, %s2265_s18  ;;  %p2269_p7 = scmp.lt.u32.totalorder %s2265_s18, %s2673_s11 }
  0x6a   :  { %p2271_p8 = pnand %p2269_p7, %p2266_p6 }
  0x6c   :  { %2274 = shalt.err (!%p2271_p8)
}
  0x6d   :  { %s2275_s22 = scalar_lea.vmem %s111_s24, 1024  ;;  %p2280_p10 = scmp.lt.s32.totalorder %s111_s24, %s111_s24 }
  0x6e   :  { %p2276_p9 = scmp.ne.s32.totalorder %s111_s24, %s2275_s22  ;;  %p2281_p11 = scmp.lt.s32.totalorder %s2275_s22, %s2275_s22 }
  0x70   :  { %p2282_p12 = por %p2281_p11, %p2280_p10 }
  0x72   :  { %p2283_p13 = pnand %p2282_p12, %p2276_p9 }
  0x74   :  { %2286 = shalt.err (!%p2283_p13)
}
  0x75   :  { %116 = dma.hbm_to_vmem [thread:$0]  %s2673_s11, 1024, %s111_s24, [#allocation13], %s2324_s26, %s2324_s26, %s2325_s17  }
  0x76   :  { %2309 = dma.done.wait [#allocation4], 128  }
  0x77   :  { %2310 = vsyncadd [#allocation4], 4294967168 }
  0x78   :  { %2311 = dma.done.wait [#allocation7], 10240  }
  0x79   :  { %2312 = vsyncadd [#allocation7], 4294957056 }
  0x7a   :  { %2313 = dma.done.wait [#allocation10], 2048  }
  0x7b   :  { %2314 = vsyncadd [#allocation10], 4294965248 }
  0x7c   :  { %2315 = dma.done.wait [#allocation13], 2048  }
  0x7d   :  { %2316 = vsyncadd [#allocation13], 4294965248  ;;  %v2330_v0 = vmov 0   ;;  %v1989_v1 = vld [vmem:[#allocation6 + $0x4] ss:$36 sps:$4 sm:$0xff]   ;;  %vm2332_vm0 = vmmov 0  }
  0x7e   :  { %629 = vmatprep.mubr.bf16.mxu0 %v2330_v0  ;;  %141 = vst [vmem:[#allocation2] sm:$0xff] %v2330_v0  ;;  %142 = vst [vmem:[#allocation2 + $0x8] sm:$0xff] %v2330_v0  ;;  %680 = vmatprep.mubr.bf16.mxu1 %v2330_v0  ;;  %v1991_v2 = vld [vmem:[#allocation6 + $0xc] ss:$36 sps:$4 sm:$0xff]   ;;  %v1993_v3 = vld [vmem:[#allocation6] ss:$36 sps:$4 sm:$0xff]  }
  0x7f   :  { %597 = vmatprep.subr.bf16.mxu0 %v1989_v1  ;;  %v1994_v4 = vld [vmem:[#allocation6 + $0x8] ss:$36 sps:$4 sm:$0xff]   ;;  %648 = vmatprep.subr.bf16.mxu1 %v1991_v2  ;;  %v1997_v6 = vld [vmem:[#allocation6 + $0x54] ss:$36 sps:$4 sm:$0xff]   ;;  %v2003_v10 = vld [vmem:[#allocation6 + $0x9c] ss:$36 sps:$4 sm:$0xff]  }
  0x80   :  { %v1995_v5 = vld [vmem:[#allocation6 + $0x4c] ss:$36 sps:$4 sm:$0xff]   ;;  %598 = vmatpush1.bf16.msra.mxu0 %v1993_v3  ;;  %649 = vmatpush1.bf16.msra.mxu1 %v1994_v4  ;;  %v2001_v9 = vld [vmem:[#allocation6 + $0x94] ss:$36 sps:$4 sm:$0xff]   ;;  %v2007_v13 = vld [vmem:[#allocation6 + $0xdc] ss:$36 sps:$4 sm:$0xff]  }
  0x81   :  { %v1999_v7 = vld [vmem:[#allocation6 + $0x48] ss:$36 sps:$4 sm:$0xff]   ;;  %599 = vmatprep.subr.bf16.mxu0 %v1995_v5  ;;  %v2000_v8 = vld [vmem:[#allocation6 + $0x50] ss:$36 sps:$4 sm:$0xff]   ;;  %650 = vmatprep.subr.bf16.mxu1 %v1997_v6  ;;  %v2006_v12 = vld [vmem:[#allocation6 + $0x98] ss:$36 sps:$4 sm:$0xff]  }
  0x82   :  { %v2005_v11 = vld [vmem:[#allocation6 + $0x90] ss:$36 sps:$4 sm:$0xff]   ;;  %v2009_v14 = vld [vmem:[#allocation6 + $0xe4] ss:$36 sps:$4 sm:$0xff]   ;;  %v2011_v15 = vld [vmem:[#allocation6 + $0xd8] ss:$36 sps:$4 sm:$0xff]  }
  0x83   :  { %v2012_v16 = vld [vmem:[#allocation6 + $0xe0] ss:$36 sps:$4 sm:$0xff]   ;;  %v2015_v18 = vld [vmem:[#allocation6 + $0x12c] ss:$36 sps:$4 sm:$0xff]   ;;  %v2021_v22 = vld [vmem:[#allocation6 + $0x174] ss:$36 sps:$4 sm:$0xff]  }
  0x84   :  { %600 = vmatpush1.bf16.msra.mxu0 %v1999_v7  ;;  %651 = vmatpush1.bf16.msra.mxu1 %v2000_v8  ;;  %v2013_v17 = vld [vmem:[#allocation6 + $0x124] ss:$36 sps:$4 sm:$0xff]   ;;  %v2019_v21 = vld [vmem:[#allocation6 + $0x16c] ss:$36 sps:$4 sm:$0xff]   ;;  %v2025_v25 = vld [vmem:[#allocation6 + $0x1b4] ss:$36 sps:$4 sm:$0xff]  }
  0x85   :  { %601 = vmatprep.subr.bf16.mxu0 %v2001_v9  ;;  %652 = vmatprep.subr.bf16.mxu1 %v2003_v10  ;;  %v2017_v19 = vld [vmem:[#allocation6 + $0x120] ss:$36 sps:$4 sm:$0xff]   ;;  %v2018_v20 = vld [vmem:[#allocation6 + $0x128] ss:$36 sps:$4 sm:$0xff]   ;;  %v2024_v24 = vld [vmem:[#allocation6 + $0x170] ss:$36 sps:$4 sm:$0xff]  }
  0x86   :  { %v2023_v23 = vld [vmem:[#allocation6 + $0x168] ss:$36 sps:$4 sm:$0xff]   ;;  %v2027_v26 = vld [vmem:[#allocation6 + $0x1bc] ss:$36 sps:$4 sm:$0xff]   ;;  %v143_v27 = vld [vmem:[#allocation3] sm:$0xf] }
  0x87   :  { %145 = vst [vmem:[#allocation2] sm:$0xf] %v143_v27  ;;  %v2029_v28 = vld [vmem:[#allocation6 + $0x1b0] ss:$36 sps:$4 sm:$0xff]   ;;  %v2030_v29 = vld [vmem:[#allocation6 + $0x1b8] ss:$36 sps:$4 sm:$0xff]  }
  0x88   :  { %602 = vmatpush1.bf16.msra.mxu0 %v2005_v11  ;;  %653 = vmatpush1.bf16.msra.mxu1 %v2006_v12  ;;  %v2031_v30 = vld [vmem:[#allocation6 + $0x1fc] ss:$36 sps:$4 sm:$0xff]   ;;  %v2033_v31 = vld [vmem:[#allocation6 + $0x204] ss:$36 sps:$4 sm:$0xff]   ;;  %v2039_v35 = vld [vmem:[#allocation6 + $0x14] ss:$36 sps:$4 sm:$0xff]  }
  0x89   :  { %603 = vmatprep.subr.bf16.mxu0 %v2007_v13  ;;  %654 = vmatprep.subr.bf16.mxu1 %v2009_v14  ;;  %v144_v32 = vld [vmem:[#allocation3 + $0x4] sm:$0xf]  ;;  %v2036_v34 = vld [vmem:[#allocation6 + $0x200] ss:$36 sps:$4 sm:$0xff]   ;;  %v2037_v37 = vld [vmem:[#allocation6 + $0x10] ss:$36 sps:$4 sm:$0xff]  }
  0x8a   :  { %v2035_v33 = vld [vmem:[#allocation6 + $0x1f8] ss:$36 sps:$4 sm:$0xff]   ;;  %146 = vst [vmem:[#allocation2 + $0x8] sm:$0xf] %v144_v32  ;;  %v2048_v41 = vld [vmem:[#allocation6 + $0x64] ss:$36 sps:$4 sm:$0xff]  }
  0x8b   :  { %v2042_v36 = vld [vmem:[#allocation6 + $0x1c] ss:$36 sps:$4 sm:$0xff]   ;;  %v2051_v44 = vld [vmem:[#allocation6 + $0xa4] ss:$36 sps:$4 sm:$0xff]   ;;  %v2054_v45 = vld [vmem:[#allocation6 + $0xac] ss:$36 sps:$4 sm:$0xff]  }
  0x8c   :  { %604 = vmatpush1.bf16.msra.mxu0 %v2011_v15  ;;  %655 = vmatpush1.bf16.msra.mxu1 %v2012_v16  ;;  %v2040_v38 = vld [vmem:[#allocation6 + $0x18] ss:$36 sps:$4 sm:$0xff]   ;;  %v2046_v43 = vld [vmem:[#allocation6 + $0x60] ss:$36 sps:$4 sm:$0xff]   ;;  %v2052_v47 = vld [vmem:[#allocation6 + $0xa8] ss:$36 sps:$4 sm:$0xff]  }
  0x8d   :  { %605 = vmatprep.subr.bf16.mxu0 %v2013_v17  ;;  %656 = vmatprep.subr.bf16.mxu1 %v2015_v18  ;;  %v2045_v40 = vld [vmem:[#allocation6 + $0x5c] ss:$36 sps:$4 sm:$0xff]   ;;  %v2057_v48 = vld [vmem:[#allocation6 + $0xec] ss:$36 sps:$4 sm:$0xff]   ;;  %v2060_v50 = vld [vmem:[#allocation6 + $0xf4] ss:$36 sps:$4 sm:$0xff]  }
  0x8e   :  { %v2513_v39 = vld [vmem:[#allocation2] sm:$0xff]  ;;  %v2043_v42 = vld [vmem:[#allocation6 + $0x58] ss:$36 sps:$4 sm:$0xff]   ;;  %v2049_v46 = vld [vmem:[#allocation6 + $0xa0] ss:$36 sps:$4 sm:$0xff]   ;;  %v2331_v14 = vmov 0.0  }
  0x8f   :  { %v2055_v51 = vld [vmem:[#allocation6 + $0xe8] ss:$36 sps:$4 sm:$0xff]   ;;  %v2058_v52 = vld [vmem:[#allocation6 + $0xf0] ss:$36 sps:$4 sm:$0xff]   ;;  %v2066_v54 = vld [vmem:[#allocation6 + $0x13c] ss:$36 sps:$4 sm:$0xff]  }
  0x90   :  { %606 = vmatpush1.bf16.msra.mxu0 %v2017_v19  ;;  %657 = vmatpush1.bf16.msra.mxu1 %v2018_v20  ;;  %v2063_v53 = vld [vmem:[#allocation6 + $0x134] ss:$36 sps:$4 sm:$0xff]   ;;  %v2069_v57 = vld [vmem:[#allocation6 + $0x17c] ss:$36 sps:$4 sm:$0xff]   ;;  %v2072_v58 = vld [vmem:[#allocation6 + $0x184] ss:$36 sps:$4 sm:$0xff]  }
  0x91   :  { %607 = vmatprep.subr.bf16.mxu0 %v2019_v21  ;;  %658 = vmatprep.subr.bf16.mxu1 %v2021_v22  ;;  %v2519_v49 = vld [vmem:[#allocation2 + $0x8] sm:$0xff]  ;;  %v2064_v56 = vld [vmem:[#allocation6 + $0x138] ss:$36 sps:$4 sm:$0xff]   ;;  %v2070_v60 = vld [vmem:[#allocation6 + $0x180] ss:$36 sps:$4 sm:$0xff]   ;;  %vm851_vm1 = vcmask 1046528  }
  0x92   :  { %v2061_v55 = vld [vmem:[#allocation6 + $0x130] ss:$36 sps:$4 sm:$0xff]   ;;  %v2067_v59 = vld [vmem:[#allocation6 + $0x178] ss:$36 sps:$4 sm:$0xff]   ;;  %v2075_v61 = vld [vmem:[#allocation6 + $0x1c4] ss:$36 sps:$4 sm:$0xff]  }
  0x93   :  { %v2078_v62 = vld [vmem:[#allocation6 + $0x1cc] ss:$36 sps:$4 sm:$0xff]   ;;  %v2073_v63 = vld [vmem:[#allocation6 + $0x1c0] ss:$36 sps:$4 sm:$0xff]   ;;  %v2084_v3 = vld [vmem:[#allocation6 + $0x214] ss:$36 sps:$4 sm:$0xff]  }
  0x94   :  { %608 = vmatpush1.bf16.msra.mxu0 %v2023_v23  ;;  %659 = vmatpush1.bf16.msra.mxu1 %v2024_v24  ;;  %v2076_v1 = vld [vmem:[#allocation6 + $0x1c8] ss:$36 sps:$4 sm:$0xff]   ;;  %v2082_v5 = vld [vmem:[#allocation6 + $0x210] ss:$36 sps:$4 sm:$0xff]   ;;  %v2085_v6 = vld [vmem:[#allocation6 + $0x20] ss:$36 sps:$4 sm:$0xff]  }
  0x95   :  { %609 = vmatprep.subr.bf16.mxu0 %v2025_v25  ;;  %660 = vmatprep.subr.bf16.mxu1 %v2027_v26  ;;  %v2081_v2 = vld [vmem:[#allocation6 + $0x20c] ss:$36 sps:$4 sm:$0xff]   ;;  %v2088_v9 = vld [vmem:[#allocation6 + $0xf8] ss:$36 sps:$4 sm:$0xff]   ;;  %v2089_v10 = vld [vmem:[#allocation6 + $0x140] ss:$36 sps:$4 sm:$0xff]  }
  0x96   :  { %v2079_v4 = vld [vmem:[#allocation6 + $0x208] ss:$36 sps:$4 sm:$0xff]   ;;  %v2087_v8 = vld [vmem:[#allocation6 + $0xb0] ss:$36 sps:$4 sm:$0xff]   ;;  %v2093_v13 = vld [vmem:[#allocation8] sm:$0xff]   ;;  %vm903_vm2 = vcmask 1045504  }
  0x97   :  { %v2086_v7 = vld [vmem:[#allocation6 + $0x68] ss:$36 sps:$4 sm:$0xff]   ;;  %v2091_v12 = vld [vmem:[#allocation6 + $0x1d0] ss:$36 sps:$4 sm:$0xff]   ;;  %v2096_v17 = vld [vmem:[#allocation8 + $0x18] sm:$0xff]   ;;  %vm1065_vm3 = vcmask 1041409  }
  0x98   :  { %610 = vmatpush1.bf16.msra.mxu0 %v2029_v28  ;;  %661 = vmatpush1.bf16.msra.mxu1 %v2030_v29  ;;  %v2090_v11 = vld [vmem:[#allocation6 + $0x188] ss:$36 sps:$4 sm:$0xff]   ;;  %v2095_v16 = vld [vmem:[#allocation8 + $0x10] sm:$0xff]   ;;  %v2097_v18 = vld [vmem:[#allocation8 + $0x20] sm:$0xff]   ;;  %vm971_vm4 = vcmask 1044480  }
  0x99   :  { %611 = vmatprep.subr.bf16.mxu0 %v2031_v30  ;;  %662 = vmatprep.subr.bf16.mxu1 %v2033_v31  ;;  %v2094_v15 = vld [vmem:[#allocation8 + $0x8] sm:$0xff]   ;;  %v2099_v20 = vld [vmem:[#allocation8 + $0x30] sm:$0xff]   ;;  %v2100_v21 = vld [vmem:[#allocation8 + $0x38] sm:$0xff]   ;;  %v863_v30 = vlaneseq }
  0x9a   :  { %v2098_v19 = vld [vmem:[#allocation8 + $0x28] sm:$0xff]   ;;  %v2101_v22 = vld [vmem:[#allocation9] sm:$0xff]   ;;  %v2103_v24 = vld [vmem:[#allocation9 + $0x10] sm:$0xff]  }
  0x9b   :  { %v2102_v23 = vld [vmem:[#allocation9 + $0x8] sm:$0xff]   ;;  %v2104_v25 = vld [vmem:[#allocation9 + $0x18] sm:$0xff]   ;;  %v2105_v26 = vld [vmem:[#allocation9 + $0x20] sm:$0xff]   ;;  %v2555_v31 = vshrl.u32 %v863_v30, 7 }
  0x9c   :  { %612 = vmatpush1.bf16.msra.mxu0 %v2035_v33  ;;  %663 = vmatpush1.bf16.msra.mxu1 %v2036_v34  ;;  %v2106_v27 = vld [vmem:[#allocation9 + $0x28] sm:$0xff]   ;;  %v2107_v28 = vld [vmem:[#allocation9 + $0x30] sm:$0xff]   ;;  %v2108_v29 = vld [vmem:[#allocation9 + $0x38] sm:$0xff]  }
  0x9d   :  { %697 = vmatprep.subr.bf16.mxu0 %v2039_v35  ;;  %748 = vmatprep.subr.bf16.mxu1 %v2042_v36  ;;  %v2558_v35 = vsub.s32 0, %v2555_v31 }
  0x9f   :  { %630 = vmatmul.mubr.bf16.vlgmr.msra.gmra.mrb[0].mxu0 %v2513_v39  ;;  %681 = vmatmul.mubr.bf16.vlgmr.msra.gmra.mrb[0].mxu1 %v2513_v39 }
  0xa0   :  { %698 = vmatpush1.bf16.msra.mxu0 %v2037_v37  ;;  %749 = vmatpush1.bf16.msra.mxu1 %v2040_v38 }
  0xa1   :  { %699 = vmatprep.subr.bf16.mxu0 %v2045_v40  ;;  %750 = vmatprep.subr.bf16.mxu1 %v2048_v41 }
  0xa2   :  { %638 = vmatprep.mubr.bf16.mxu0 %v2330_v0  ;;  %688 = vmatprep.mubr.bf16.mxu1 %v2330_v0 }
  0xa4   :  { %700 = vmatpush1.bf16.msra.mxu0 %v2043_v42  ;;  %751 = vmatpush1.bf16.msra.mxu1 %v2046_v43  ;;  %v846_v42 = vld [vmem:[%s2665_s3] sm:$0x1] }
  0xa5   :  { %701 = vmatprep.subr.bf16.mxu0 %v2051_v44  ;;  %752 = vmatprep.subr.bf16.mxu1 %v2054_v45 }
  0xa7   :  { %639 = vmatmul.mubr.bf16.gmra.mrb[4].mxu0 %v2519_v49  ;;  %689 = vmatmul.mubr.bf16.gmra.mrb[4].mxu1 %v2519_v49 }
  0xa8   :  { %702 = vmatpush1.bf16.msra.mxu0 %v2049_v46  ;;  %753 = vmatpush1.bf16.msra.mxu1 %v2052_v47  ;;  %v866_v46 = vrot.slane %v846_v42, %v2558_v35 }
  0xa9   :  { %703 = vmatprep.subr.bf16.mxu0 %v2057_v48  ;;  %754 = vmatprep.subr.bf16.mxu1 %v2060_v50 }
  0xaa   :  { %729 = vmatprep.mubr.bf16.mxu0 %v2330_v0  ;;  %780 = vmatprep.mubr.bf16.mxu1 %v2330_v0 }
  0xac   :  { %704 = vmatpush1.bf16.msra.mxu0 %v2055_v51  ;;  %755 = vmatpush1.bf16.msra.mxu1 %v2058_v52 }
  0xad   :  { %705 = vmatprep.subr.bf16.mxu0 %v2063_v53  ;;  %756 = vmatprep.subr.bf16.mxu1 %v2066_v54 }
  0xb0   :  { %706 = vmatpush1.bf16.msra.mxu0 %v2061_v55  ;;  %757 = vmatpush1.bf16.msra.mxu1 %v2064_v56 }
  0xb1   :  { %707 = vmatprep.subr.bf16.mxu0 %v2069_v57  ;;  %758 = vmatprep.subr.bf16.mxu1 %v2072_v58 }
  0xb4   :  { %708 = vmatpush1.bf16.msra.mxu0 %v2067_v59  ;;  %759 = vmatpush1.bf16.msra.mxu1 %v2070_v60 }
  0xb5   :  { %709 = vmatprep.subr.bf16.mxu0 %v2075_v61  ;;  %760 = vmatprep.subr.bf16.mxu1 %v2078_v62 }
  0xb8   :  { %710 = vmatpush1.bf16.msra.mxu0 %v2073_v63  ;;  %761 = vmatpush1.bf16.msra.mxu1 %v2076_v1 }
  0xb9   :  { %711 = vmatprep.subr.bf16.mxu0 %v2081_v2  ;;  %762 = vmatprep.subr.bf16.mxu1 %v2084_v3 }
  0xbc   :  { %712 = vmatpush1.bf16.msra.mxu0 %v2079_v4  ;;  %763 = vmatpush1.bf16.msra.mxu1 %v2082_v5 }
  0xbd   :  { %1851 = vmatprep.subr.bf16.mxu0 %v2085_v6  ;;  %1871 = vmatprep.subr.bf16.mxu1 %v2331_v14 }
  0xbf   :  { %730 = vmatmul.mubr.bf16.vlgmr.msra.gmra.mrb[8].mxu0 %v2513_v39  ;;  %781 = vmatmul.mubr.bf16.vlgmr.msra.gmra.mrb[8].mxu1 %v2513_v39 }
  0xc0   :  { %1852 = vmatpush3.bf16.msra.mxu0 %v2085_v6  ;;  %738 = vmatprep.mubr.bf16.mxu0 %v2330_v0 }
  0xc1   :  { %1853 = vmatprep.subr.bf16.mxu0 %v2086_v7  ;;  %788 = vmatprep.mubr.bf16.mxu1 %v2330_v0  ;;  %v2092_v0 = vld [vmem:[#allocation6 + $0x218] ss:$36 sps:$4 sm:$0xff]  }
  0xc2   :  { %1872 = vmatpush3.bf16.msra.mxu1 %v2101_v22  ;;  %v2579_v22 = vld [vmem:[%s2666_s4] sm:$0x1] }
  0xc3   :  { %1873 = vmatprep.subr.bf16.mxu1 %v2331_v14 }
  0xc4   :  { %1854 = vmatpush3.bf16.msra.mxu0 %v2086_v7 }
  0xc5   :  { %1855 = vmatprep.subr.bf16.mxu0 %v2087_v8 }
  0xc6   :  { %1874 = vmatpush3.bf16.msra.mxu1 %v2102_v23 }
  0xc7   :  { %739 = vmatmul.mubr.bf16.gmra.mrb[12].mxu0 %v2519_v49  ;;  %789 = vmatmul.mubr.bf16.gmra.mrb[12].mxu1 %v2519_v49 }
  0xc8   :  { %1856 = vmatpush3.bf16.msra.mxu0 %v2087_v8  ;;  %1867 = vmatprep.mubr.bf16.mxu0 %v2513_v39 }
  0xc9   :  { %1857 = vmatprep.subr.bf16.mxu0 %v2088_v9  ;;  %1887 = vmatprep.mubr.msk.bf16.mxu1 %vm2332_vm0, %v2331_v14 }
  0xca   :  { %1875 = vmatprep.subr.bf16.mxu1 %v2331_v14 }
  0xcb   :  { %1876 = vmatpush3.bf16.msra.mxu1 %v2103_v24 }
  0xcc   :  { %1858 = vmatpush3.bf16.msra.mxu0 %v2088_v9  ;;  %1877 = vmatprep.subr.bf16.mxu1 %v2331_v14 }
  0xcd   :  { %1859 = vmatprep.subr.bf16.mxu0 %v2089_v10 }
  0xcf   :  { %1878 = vmatpush3.bf16.msra.mxu1 %v2104_v25 }
  0xd0   :  { %1860 = vmatpush3.bf16.msra.mxu0 %v2089_v10  ;;  %1879 = vmatprep.subr.bf16.mxu1 %v2331_v14 }
  0xd1   :  { %1861 = vmatprep.subr.bf16.mxu0 %v2090_v11 }
  0xd3   :  { %1880 = vmatpush3.bf16.msra.mxu1 %v2105_v26 }
  0xd4   :  { %1862 = vmatpush3.bf16.msra.mxu0 %v2090_v11  ;;  %1881 = vmatprep.subr.bf16.mxu1 %v2331_v14 }
  0xd5   :  { %1863 = vmatprep.subr.bf16.mxu0 %v2091_v12 }
  0xd7   :  { %1882 = vmatpush3.bf16.msra.mxu1 %v2106_v27 }
  0xd8   :  { %1864 = vmatpush3.bf16.msra.mxu0 %v2091_v12  ;;  %1883 = vmatprep.subr.bf16.mxu1 %v2331_v14 }
  0xd9   :  { %1865 = vmatprep.subr.bf16.mxu0 %v2092_v0 }
  0xdb   :  { %1884 = vmatpush3.bf16.msra.mxu1 %v2107_v28 }
  0xdc   :  { %1866 = vmatpush3.bf16.msra.mxu0 %v2092_v0  ;;  %1885 = vmatprep.subr.bf16.mxu1 %v2331_v14 }
  0xdd   :  { %1891 = vmatprep.subr.bf16.mxu0 %v2331_v14 }
  0xdf   :  { %1868 = vmatmul.mubr.bf16.vlgmr.msra.gmra.mrb[16].mxu0 %v2519_v49  ;;  %1886 = vmatpush3.bf16.msra.mxu1 %v2108_v29 }
  0xe0   :  { %1892 = vmatpush3.bf16.msra.mxu0 %v2093_v13  ;;  %1907 = vmatprep.mubr.msk.bf16.mxu0 %vm2332_vm0, %v2331_v14 }
  0xe1   :  { %1893 = vmatprep.subr.bf16.mxu0 %v2331_v14  ;;  %1911 = vmatprep.subr.bf16.mxu1 %v2331_v14 }
  0xe4   :  { %1894 = vmatpush3.bf16.msra.mxu0 %v2094_v15 }
  0xe5   :  { %1895 = vmatprep.subr.bf16.mxu0 %v2331_v14 }
  0xe8   :  { %1896 = vmatpush3.bf16.msra.mxu0 %v2095_v16 }
  0xe9   :  { %1897 = vmatprep.subr.bf16.mxu0 %v2331_v14 }
  0xec   :  { %1898 = vmatpush3.bf16.msra.mxu0 %v2096_v17 }
  0xed   :  { %1899 = vmatprep.subr.bf16.mxu0 %v2331_v14 }
  0xf0   :  { %1900 = vmatpush3.bf16.msra.mxu0 %v2097_v18 }
  0xf1   :  { %1901 = vmatprep.subr.bf16.mxu0 %v2331_v14 }
  0xf4   :  { %1902 = vmatpush3.bf16.msra.mxu0 %v2098_v19 }
  0xf5   :  { %1903 = vmatprep.subr.bf16.mxu0 %v2331_v14 }
  0xf8   :  { %1904 = vmatpush3.bf16.msra.mxu0 %v2099_v20 }
  0xf9   :  { %1905 = vmatprep.subr.bf16.mxu0 %v2331_v14 }
  0xfc   :  { %1906 = vmatpush3.bf16.msra.mxu0 %v2100_v21 }
  0xfd   :  { %1931 = vmatprep.subr.bf16.mxu0 %v2331_v14 }
 0x172   :  { %v631_v32 = vpop.f32.mrb[0].mxu0  ;;  %v682_v33 = vpop.f32.mrb[0].mxu1 }
 0x173   :  { %v633_v34 = vpop.f32.mrb[1].mxu0  ;;  %v2560_v36 = vpop.f32.mrb[1].mxu1 }
 0x174   :  { %v635_v37 = vpop.f32.mrb[2].mxu0  ;;  %v893_v38 = vrot.slane %v2560_v36, 1  ;;  %v686_v39 = vpop.f32.mrb[2].mxu1  ;;  %v852_v43 = vrot.slane %v633_v34, 1  ;;  %v884_v6 = vadd.f32 %v846_v42, %v633_v34 }
 0x175   :  { %v636_v40 = vpop.f32.mrb[3].mxu0  ;;  %v687_v41 = vpop.f32.mrb[3].mxu1 }
 0x176   :  { %v853_v44 = vrot.slane %v636_v40, 1  ;;  %v2566_v45 = vadd.f32 %v893_v38, %v682_v33  ;;  %v886_v11 = vmax.f32 %v884_v6, 0.0 }
 0x178   :  { %v854_v47 = vsel %vm851_vm1, %v852_v43, %v853_v44  ;;  %v918_v44 = vrot.slane %v2579_v22, %v2558_v35 }
 0x179   :  { %v860_v48 = vadd.f32 %v854_v47, %v631_v32 }
 0x17a   :  { %v640_v49 = vpop.f32.mrb[4].mxu0  ;;  %v690_v50 = vpop.f32.mrb[4].mxu1 }
 0x17b   :  { %v868_v51 = vadd.f32 %v866_v46, %v860_v48  ;;  %v642_v52 = vpop.f32.mrb[5].mxu0  ;;  %v2570_v53 = vpop.f32.mrb[5].mxu1 }
 0x17c   :  { %v855_v54 = vrot.slane %v642_v52, 1  ;;  %v644_v55 = vpop.f32.mrb[6].mxu0  ;;  %v894_v56 = vrot.slane %v2570_v53, 1  ;;  %v694_v57 = vpop.f32.mrb[6].mxu1  ;;  %v885_v16 = vadd.f32 %v846_v42, %v642_v52 }
 0x17d   :  { %v870_v58 = vmax.f32 %v868_v51, 0.0  ;;  %v645_v59 = vpop.f32.mrb[7].mxu0  ;;  %v695_v60 = vpop.f32.mrb[7].mxu1 }
 0x17e   :  { %v856_v61 = vrot.slane %v645_v59, 1  ;;  %v2573_v62 = vadd.f32 %v894_v56, %v690_v50  ;;  %v887_v19 = vmax.f32 %v885_v16, 0.0 }
 0x17f   :  { %v872_v63 = vrot.slane %v870_v58, 4 }
 0x180   :  { %v857_v1 = vsel %vm851_vm1, %v855_v54, %v856_v61 }
 0x181   :  { %v873_v2 = vmax.f32 %v870_v58, %v872_v63  ;;  %v861_v3 = vadd.f32 %v857_v1, %v640_v49 }
 0x183   :  { %v874_v4 = vrot.slane %v873_v2, 2  ;;  %v869_v5 = vadd.f32 %v866_v46, %v861_v3 }
 0x185   :  { %v875_v7 = vmax.f32 %v873_v2, %v874_v4  ;;  %v871_v8 = vmax.f32 %v869_v5, 0.0 }
 0x187   :  { %v876_v9 = vrot.slane %v875_v7, 1  ;;  %v878_v10 = vrot.slane %v871_v8, 4 }
 0x189   :  { %v877_v12 = vmax.f32 %v875_v7, %v876_v9  ;;  %v879_v0 = vmax.f32 %v871_v8, %v878_v10 }
 0x18b   :  { %v880_v13 = vrot.slane %v879_v0, 2  ;;  %v888_v15 = vmax.f32 %v877_v12, %v886_v11 }
 0x18d   :  { %v881_v17 = vmax.f32 %v879_v0, %v880_v13  ;;  %v1024_v37 = vpack.c.bf16 %v888_v15, %v888_v15 }
 0x18f   :  { %v882_v18 = vrot.slane %v881_v17, 1  ;;  %v1159_v51 = vunpack.c.l.b16 %v1024_v37 }
 0x191   :  { %v883_v20 = vmax.f32 %v881_v17, %v882_v18 }
 0x192   :  { %v731_v21 = vpop.f32.mrb[8].mxu0  ;;  %v782_v23 = vpop.f32.mrb[8].mxu1 }
 0x193   :  { %v938_v24 = vrot.slane %v731_v21, 1  ;;  %v953_v25 = vrot.slane %v782_v23, 1  ;;  %v733_v26 = vpop.f32.mrb[9].mxu0  ;;  %v784_v27 = vpop.f32.mrb[9].mxu1  ;;  %v889_v28 = vmax.f32 %v883_v20, %v887_v19  ;;  %v904_v29 = vrot.slane %v731_v21, 2 }
 0x194   :  { %v735_v30 = vpop.f32.mrb[10].mxu0  ;;  %v961_v32 = vrot.slane %v784_v27, 2  ;;  %v1006_v33 = vrot.slane %v784_v27, 1  ;;  %v786_v34 = vpop.f32.mrb[10].mxu1 }
 0x195   :  { %v942_v38 = vadd.f32 %v938_v24, %v2560_v36  ;;  %v957_v39 = vadd.f32 %v953_v25, %v733_v26  ;;  %v905_v40 = vrot.slane %v735_v30, 2  ;;  %v737_v41 = vpop.f32.mrb[11].mxu0  ;;  %v787_v42 = vpop.f32.mrb[11].mxu1  ;;  %v1025_v43 = vpack.c.bf16 %v889_v28, %v889_v28 }
 0x196   :  { %v2584_v46 = vadd.f32 %v1006_v33, %v782_v23 }
 0x197   :  { %v906_v47 = vsel %vm903_vm2, %v904_v29, %v905_v40  ;;  %v2587_v48 = vadd.f32 %v961_v32, %v957_v39  ;;  %v1160_v49 = vunpack.c.l.b16 %v1025_v43  ;;  %v944_v19 = vadd.f32 %v942_v38, %v2579_v22  ;;  %v950_v38 = vld [vmem:[%s2667_s5] sm:$0x1] }
 0x198   :  { %v912_v50 = vadd.f32 %v906_v47, %v2566_v45 }
 0x199   :  { %v1161_v36 = vrot.slane %v1160_v49, 7  ;;  %v946_v25 = vmax.f32 %v944_v19, 0.0 }
 0x19a   :  { %v920_v52 = vadd.f32 %v918_v44, %v912_v50  ;;  %v740_v54 = vpop.f32.mrb[12].mxu0  ;;  %v790_v55 = vpop.f32.mrb[12].mxu1 }
 0x19b   :  { %v939_v56 = vrot.slane %v740_v54, 1  ;;  %v954_v57 = vrot.slane %v790_v55, 1  ;;  %v742_v58 = vpop.f32.mrb[13].mxu0  ;;  %v792_v59 = vpop.f32.mrb[13].mxu1  ;;  %v1162_v60 = vsel %vm1065_vm3, %v1161_v36, %v1159_v51  ;;  %v907_v5 = vrot.slane %v740_v54, 2 }
 0x19c   :  { %v922_v61 = vmax.f32 %v920_v52, 0.0  ;;  %v744_v63 = vpop.f32.mrb[14].mxu0  ;;  %v962_v1 = vrot.slane %v792_v59, 2  ;;  %v1007_v2 = vrot.slane %v792_v59, 1  ;;  %v1163_v3 = vpack.c.b16 %v1162_v60, %v1162_v60  ;;  %v794_v4 = vpop.f32.mrb[14].mxu1 }
 0x19d   :  { %v943_v45 = vadd.f32 %v939_v56, %v2570_v53  ;;  %v958_v6 = vadd.f32 %v954_v57, %v742_v58  ;;  %v908_v7 = vrot.slane %v744_v63, 2  ;;  %v746_v8 = vpop.f32.mrb[15].mxu0  ;;  %v795_v9 = vpop.f32.mrb[15].mxu1  ;;  %v986_v54 = vrot.slane %v950_v38, %v2558_v35  ;;  %v2109_v4 = vld [vmem:[#allocation11] sm:$0xff]  }
 0x19e   :  { %v924_v10 = vsel %vm851_vm1, %v922_v61, -inf  ;;  %v1011_v11 = vadd.f32 %v1007_v2, %v790_v55  ;;  %1908 = vmatmul.mubr.bf16.vlgmr.msra.gmra.mrb[20].mxu0 %v1163_v3  ;;  %v2110_v8 = vld [vmem:[#allocation11 + $0x8] sm:$0xff]  }
 0x19f   :  { %v925_v12 = vrot.slane %v924_v10, 4  ;;  %v909_v0 = vsel %vm903_vm2, %v907_v5, %v908_v7  ;;  %v966_v13 = vadd.f32 %v962_v1, %v958_v6  ;;  %1947 = vmatprep.mubr.msk.bf16.mxu0 %vm2332_vm0, %v2331_v14  ;;  %v945_v30 = vadd.f32 %v943_v45, %v2579_v22 }
 0x1a0   :  { %v913_v15 = vadd.f32 %v909_v0, %v2573_v62 }
 0x1a1   :  { %v926_v16 = vmax.f32 %v924_v10, %v925_v12  ;;  %v947_v33 = vmax.f32 %v945_v30, 0.0  ;;  %v2111_v12 = vld [vmem:[#allocation11 + $0x10] sm:$0xff]   ;;  %v2114_v30 = vld [vmem:[#allocation11 + $0x28] sm:$0xff]  }
 0x1a2   :  { %v921_v17 = vadd.f32 %v918_v44, %v913_v15 }
 0x1a3   :  { %v927_v53 = vrot.slane %v926_v16, 2 }
 0x1a4   :  { %v923_v18 = vmax.f32 %v921_v17, 0.0 }
 0x1a5   :  { %v928_v20 = vmax.f32 %v926_v16, %v927_v53 }
 0x1a6   :  { %v931_v21 = vsel %vm851_vm1, %v923_v18, -inf  ;;  %v2112_v18 = vld [vmem:[#allocation11 + $0x18] sm:$0xff]  }
 0x1a7   :  { %v929_v23 = vrot.slane %v928_v20, 1  ;;  %v932_v24 = vrot.slane %v931_v21, 4 }
 0x1a9   :  { %v930_v26 = vmax.f32 %v928_v20, %v929_v23  ;;  %v933_v27 = vmax.f32 %v931_v21, %v932_v24 }
 0x1ab   :  { %v948_v28 = vmax.f32 %v930_v26, %v946_v25  ;;  %v934_v29 = vrot.slane %v933_v27, 2  ;;  %v2113_v25 = vld [vmem:[#allocation11 + $0x20] sm:$0xff]  }
 0x1ad   :  { %v935_v32 = vmax.f32 %v933_v27, %v934_v29  ;;  %v1042_v51 = vpack.c.bf16 %v948_v28, %v948_v28 }
 0x1af   :  { %v936_v62 = vrot.slane %v935_v32, 1  ;;  %v1062_v61 = vunpack.c.l.b16 %v1042_v51 }
 0x1b1   :  { %v937_v34 = vmax.f32 %v935_v32, %v936_v62 }
 0x1b2   :  { %v1869_v37 = vpop.f32.mrb[16].mxu0 }
 0x1b3   :  { %v949_v39 = vmax.f32 %v937_v34, %v947_v33  ;;  %v975_v40 = vrot.slane %v1869_v37, 3  ;;  %v1013_v41 = vrot.slane %v1869_v37, 2  ;;  %v831_v42 = vpop.f32.mrb[17].mxu0  ;;  %v2115_v34 = vld [vmem:[#allocation11 + $0x30] sm:$0xff]  }
 0x1b4   :  { %v972_v43 = vrot.slane %v831_v42, 3  ;;  %v1012_v44 = vrot.slane %v831_v42, 2  ;;  %v1870_v47 = vpop.f32.mrb[18].mxu0  ;;  %v2119_v42 = vld [vmem:[#allocation12 + $0x8] sm:$0xff]  }
 0x1b5   :  { %v1017_v49 = vadd.f32 %v1013_v41, %v1011_v11  ;;  %v976_v50 = vrot.slane %v1870_v47, 3  ;;  %v834_v22 = vpop.f32.mrb[19].mxu0  ;;  %v1043_v36 = vpack.c.bf16 %v949_v39, %v949_v39  ;;  %v2116_v39 = vld [vmem:[#allocation11 + $0x38] sm:$0xff]   ;;  %v2118_v41 = vld [vmem:[#allocation14] sm:$0xff]   ;;  %v2122_v47 = vld [vmem:[#allocation14 + $0x10] sm:$0xff]  }
 0x1b6   :  { %v1016_v52 = vadd.f32 %v1012_v44, %v2584_v46  ;;  %v973_v55 = vrot.slane %v834_v22, 3  ;;  %1932 = vmatpush3.bf16.msra.mxu0 %v2118_v41  ;;  %v2121_v44 = vld [vmem:[#allocation12 + $0x10] sm:$0xff]   ;;  %v2333_v22 = vmov 1966171168  }
 0x1b7   :  { %v977_v56 = vsel %vm971_vm4, %v975_v40, %v976_v50  ;;  %v1063_v57 = vunpack.c.l.b16 %v1043_v36  ;;  %v2117_v40 = vld [vmem:[#allocation12] sm:$0xff]   ;;  %1933 = vmatprep.subr.bf16.mxu0 %v2331_v14  ;;  %v2124_v50 = vld [vmem:[#allocation14 + $0x18] sm:$0xff]   ;;  %v1509_v51 = vunpack.c.l.s4 %v2333_v22 }
 0x1b8   :  { %v981_v58 = vadd.f32 %v977_v56, %v966_v13  ;;  %v974_v59 = vsel %vm971_vm4, %v972_v43, %v973_v55  ;;  %v1019_v13 = vadd.f32 %v1017_v49, %v950_v38  ;;  %v1018_v16 = vadd.f32 %v1016_v52, %v950_v38  ;;  %v2120_v43 = vld [vmem:[#allocation14 + $0x8] sm:$0xff]   ;;  %v2123_v49 = vld [vmem:[#allocation12 + $0x18] sm:$0xff]   ;;  %v2125_v36 = vld [vmem:[#allocation12 + $0x20] sm:$0xff]  }
 0x1b9   :  { %v980_v60 = vadd.f32 %v974_v59, %v2587_v48  ;;  %v1064_v63 = vrot.slane %v1063_v57, 7  ;;  %v2126_v52 = vld [vmem:[#allocation14 + $0x20] sm:$0xff]   ;;  %v2127_v55 = vld [vmem:[#allocation12 + $0x28] sm:$0xff]  }
 0x1ba   :  { %v989_v1 = vadd.f32 %v986_v54, %v981_v58  ;;  %v1021_v20 = vmax.f32 %v1019_v13, 0.0  ;;  %v1020_v23 = vmax.f32 %v1018_v16, 0.0  ;;  %1934 = vmatpush3.bf16.msra.mxu0 %v2120_v43  ;;  %v2128_v56 = vld [vmem:[#allocation14 + $0x28] sm:$0xff]   ;;  %v2129_v58 = vld [vmem:[#allocation12 + $0x30] sm:$0xff]  }
 0x1bb   :  { %v988_v2 = vadd.f32 %v986_v54, %v980_v60  ;;  %v1066_v3 = vsel %vm1065_vm3, %v1064_v63, %v1062_v61  ;;  %1935 = vmatprep.subr.bf16.mxu0 %v2331_v14  ;;  %v1510_v54 = vunpack.c.0.s8 %v1509_v51  ;;  %v1784_v59 = vld.sshfl [vmem:[%s2663_s1 + $0x1] sm:$0x1 pattern:$0x75316420] }
 0x1bc   :  { %v991_v5 = vmax.f32 %v989_v1, 0.0  ;;  %v1067_v45 = vpack.c.b16 %v1066_v3, %v1066_v3  ;;  %v1783_v61 = vld.sshfl [vmem:[%s2663_s1] sm:$0x1 pattern:$0x75316420] }
 0x1bd   :  { %v990_v6 = vmax.f32 %v988_v2, 0.0  ;;  %v1513_v57 = vsub.s32 %v1510_v54, %v2555_v31  ;;  %v2130_v31 = vld [vmem:[#allocation14 + $0x30] sm:$0xff]   ;;  %v2131_v2 = vld [vmem:[#allocation12 + $0x38] sm:$0xff]  }
 0x1be   :  { %v999_v46 = vsel %vm903_vm2, %v991_v5, -inf  ;;  %1888 = vmatmul.mubr.bf16.vlgmr.msra.gmra.mrb[16].mxu1 %v1067_v45  ;;  %1936 = vmatpush3.bf16.msra.mxu0 %v2122_v47  ;;  %v2132_v45 = vld [vmem:[#allocation14 + $0x38] sm:$0xff]  }
 0x1bf   :  { %v1000_v35 = vrot.slane %v999_v46, 4  ;;  %v992_v7 = vsel %vm903_vm2, %v990_v6, -inf  ;;  %1912 = vmatpush3.bf16.msra.mxu1 %v2109_v4  ;;  %1927 = vmatprep.mubr.msk.bf16.mxu1 %vm2332_vm0, %v2331_v14  ;;  %v1528_v60 = vrot.slane %v1784_v59, %v1513_v57  ;;  %v1514_v63 = vrot.slane %v1783_v61, %v1513_v57 }
 0x1c0   :  { %v993_v48 = vrot.slane %v992_v7, 4  ;;  %1913 = vmatprep.subr.bf16.mxu1 %v2331_v14  ;;  %1937 = vmatprep.subr.bf16.mxu0 %v2331_v14 }
 0x1c1   :  { %v1001_v9 = vmax.f32 %v999_v46, %v1000_v35  ;;  %v1530_v1 = vunpack.c.l.b16 %v1528_v60  ;;  %v1529_v3 = vunpack.c.l.b16 %v1514_v63 }
 0x1c2   :  { %v994_v10 = vmax.f32 %v992_v7, %v993_v48  ;;  %1938 = vmatpush3.bf16.msra.mxu0 %v2124_v50 }
 0x1c3   :  { %v1002_v11 = vrot.slane %v1001_v9, 2  ;;  %1914 = vmatpush3.bf16.msra.mxu1 %v2110_v8  ;;  %1939 = vmatprep.subr.bf16.mxu0 %v2331_v14  ;;  %v1531_v4 = vrot.slane %v1530_v1, 7 }
 0x1c4   :  { %v995_v0 = vrot.slane %v994_v10, 2  ;;  %1915 = vmatprep.subr.bf16.mxu1 %v2331_v14 }
 0x1c5   :  { %v1003_v15 = vmax.f32 %v1001_v9, %v1002_v11  ;;  %v1532_v5 = vsel %vm1065_vm3, %v1531_v4, %v1529_v3 }
 0x1c6   :  { %v996_v17 = vmax.f32 %v994_v10, %v995_v0  ;;  %1940 = vmatpush3.bf16.msra.mxu0 %v2126_v52  ;;  %v1533_v6 = vpack.c.b16 %v1532_v5, %v1532_v5 }
 0x1c7   :  { %v1004_v53 = vrot.slane %v1003_v15, 1  ;;  %1916 = vmatpush3.bf16.msra.mxu1 %v2111_v12  ;;  %1941 = vmatprep.subr.bf16.mxu0 %v2331_v14 }
 0x1c8   :  { %v997_v19 = vrot.slane %v996_v17, 1  ;;  %1917 = vmatprep.subr.bf16.mxu1 %v2331_v14 }
 0x1c9   :  { %v1005_v21 = vmax.f32 %v1003_v15, %v1004_v53 }
 0x1ca   :  { %v998_v24 = vmax.f32 %v996_v17, %v997_v19  ;;  %1942 = vmatpush3.bf16.msra.mxu0 %v2128_v56 }
 0x1cb   :  { %1918 = vmatpush3.bf16.msra.mxu1 %v2112_v18  ;;  %v1023_v26 = vmax.f32 %v1005_v21, %v1021_v20  ;;  %1943 = vmatprep.subr.bf16.mxu0 %v2331_v14 }
 0x1cc   :  { %1919 = vmatprep.subr.bf16.mxu1 %v2331_v14  ;;  %v1022_v27 = vmax.f32 %v998_v24, %v1020_v23 }
 0x1cd   :  { %v1254_v28 = vpack.c.bf16 %v1023_v26, %v1023_v26 }
 0x1ce   :  { %v1253_v29 = vpack.c.bf16 %v1022_v27, %v1022_v27  ;;  %1944 = vmatpush3.bf16.msra.mxu0 %v2130_v31 }
 0x1cf   :  { %1920 = vmatpush3.bf16.msra.mxu1 %v2113_v25  ;;  %v1274_v32 = vunpack.c.l.b16 %v1254_v28  ;;  %1945 = vmatprep.subr.bf16.mxu0 %v2331_v14  ;;  %v1793_v25 = vld [vmem:[%s2674_s12] ss:$0 sm:$0xff] }
 0x1d0   :  { %1921 = vmatprep.subr.bf16.mxu1 %v2331_v14  ;;  %v1273_v62 = vunpack.c.l.b16 %v1253_v29 }
 0x1d1   :  { %v1275_v33 = vrot.slane %v1274_v32, 7 }
 0x1d2   :  { %1946 = vmatpush3.bf16.msra.mxu0 %v2132_v45 }
 0x1d3   :  { %1922 = vmatpush3.bf16.msra.mxu1 %v2114_v30  ;;  %v1276_v37 = vsel %vm1065_vm3, %v1275_v33, %v1273_v62 }
 0x1d4   :  { %1923 = vmatprep.subr.bf16.mxu1 %v2331_v14  ;;  %v1277_v38 = vpack.c.b16 %v1276_v37, %v1276_v37 }
 0x1d7   :  { %1924 = vmatpush3.bf16.msra.mxu1 %v2115_v34 }
 0x1d8   :  { %1925 = vmatprep.subr.bf16.mxu1 %v2331_v14 }
 0x1db   :  { %1926 = vmatpush3.bf16.msra.mxu1 %v2116_v39 }
 0x1dc   :  { %1951 = vmatprep.subr.bf16.mxu1 %v2331_v14 }
 0x1de   :  { %1928 = vmatmul.mubr.bf16.vlgmr.msra.gmra.mrb[20].mxu1 %v1277_v38 }
 0x1df   :  { %1967 = vmatprep.mubr.msk.bf16.mxu1 %vm2332_vm0, %v2331_v14  ;;  %1952 = vmatpush3.bf16.msra.mxu1 %v2117_v40 }
 0x1e0   :  { %1953 = vmatprep.subr.bf16.mxu1 %v2331_v14 }
 0x1e3   :  { %1954 = vmatpush3.bf16.msra.mxu1 %v2119_v42 }
 0x1e4   :  { %1955 = vmatprep.subr.bf16.mxu1 %v2331_v14 }
 0x1e7   :  { %1956 = vmatpush3.bf16.msra.mxu1 %v2121_v44 }
 0x1e8   :  { %1957 = vmatprep.subr.bf16.mxu1 %v2331_v14 }
 0x1eb   :  { %1958 = vmatpush3.bf16.msra.mxu1 %v2123_v49 }
 0x1ec   :  { %1959 = vmatprep.subr.bf16.mxu1 %v2331_v14 }
 0x1ef   :  { %1960 = vmatpush3.bf16.msra.mxu1 %v2125_v36 }
 0x1f0   :  { %1961 = vmatprep.subr.bf16.mxu1 %v2331_v14 }
 0x1f3   :  { %1962 = vmatpush3.bf16.msra.mxu1 %v2127_v55 }
 0x1f4   :  { %1963 = vmatprep.subr.bf16.mxu1 %v2331_v14 }
 0x1f7   :  { %1964 = vmatpush3.bf16.msra.mxu1 %v2129_v58 }
 0x1f8   :  { %1965 = vmatprep.subr.bf16.mxu1 %v2331_v14  ;;  %v1774_v14 = vld [vmem:[%s2671_s9] ss:$0 sm:$0xff]  ;;  %s2334_s9 = smov [#allocation15]  }
 0x1f9   :  { %s1663_s7 = sshll.u32 %s2334_s9, 4  ;;  %s1664_s7 = int_to_ptr.vmem [resolvable:$true] %s1663_s7 }
 0x1fa   :  { %s2287_s6 = scalar_lea.vmem %s1664_s7, 32  ;;  %p2292_p1 = scmp.lt.s32.totalorder %s1664_s7, %s1664_s7 }
 0x1fb   :  { %1966 = vmatpush3.bf16.msra.mxu1 %v2131_v2  ;;  %p2288_p0 = scmp.ne.s32.totalorder %s1664_s7, %s2287_s6  ;;  %p2293_p2 = scmp.lt.s32.totalorder %s2287_s6, %s2287_s6 }
 0x1fd   :  { %p2294_p3 = por %p2293_p2, %p2292_p1 }
 0x1fe   :  { %1968 = vmatmul.mubr.bf16.vlgmr.msra.gmra.mrb[24].mxu1 %v1533_v6 }
 0x1ff   :  { %p2295_p4 = pnand %p2294_p3, %p2288_p0 }
 0x271   :  { %v1247_v46 = vpop.f32.mrb[20].mxu0 }
 0x272   :  { %v1909_v35 = vpop.f32.mrb[21].mxu0 }
 0x273   :  { %v1250_v7 = vpop.f32.mrb[22].mxu0 }
 0x274   :  { %v1910_v8 = vpop.f32.mrb[23].mxu0 }
 0x291   :  { %v1151_v48 = vpop.f32.mrb[16].mxu1 }
 0x292   :  { %v1248_v9 = vadd.f32 %v1247_v46, %v1151_v48  ;;  %v1889_v10 = vpop.f32.mrb[17].mxu1 }
 0x293   :  { %v1154_v11 = vpop.f32.mrb[18].mxu1 }
 0x294   :  { %v1890_v12 = vpop.f32.mrb[19].mxu1 }
 0x2b1   :  { %v1361_v0 = vpop.f32.mrb[20].mxu1 }
 0x2b2   :  { %v1367_v13 = vadd.f32 %v1361_v0, %v1248_v9  ;;  %v1929_v15 = vpop.f32.mrb[21].mxu1 }
 0x2b3   :  { %v1364_v16 = vpop.f32.mrb[22].mxu1 }
 0x2b4   :  { %v1375_v17 = vadd.f32 %v1774_v14, %v1367_v13  ;;  %v1930_v53 = vpop.f32.mrb[23].mxu1 }
 0x2b6   :  { %v1394_v18 = vpack.c.bf16 %v1375_v17, %v1375_v17 }
 0x2b8   :  { %1948 = vmatmul.mubr.bf16.vlgmr.msra.gmra.mrb[24].mxu0 %v1394_v18 }
 0x2d1   :  { %v1617_v19 = vpop.f32.mrb[24].mxu1 }
 0x2d2   :  { %v1969_v20 = vpop.f32.mrb[25].mxu1 }
 0x2d3   :  { %v1620_v21 = vpop.f32.mrb[26].mxu1 }
 0x2d4   :  { %v1970_v23 = vpop.f32.mrb[27].mxu1 }
 0x38b   :  { %v1493_v24 = vpop.f32.mrb[24].mxu0 }
 0x38c   :  { %v1618_v26 = vadd.f32 %v1617_v19, %v1493_v24  ;;  %v1949_v27 = vpop.f32.mrb[25].mxu0 }
 0x38d   :  { %v1496_v28 = vpop.f32.mrb[26].mxu0 }
 0x38e   :  { %v1630_v29 = vadd.f32 %v1793_v25, %v1618_v26  ;;  %v1950_v30 = vpop.f32.mrb[27].mxu0 }
 0x390   :  { %v1638_v32 = vrot.slane %v1630_v29, %v1513_v57 }
 0x392   :  { %v1639_v62 = vcombine.high %v1638_v32, %v1638_v32  ;;  %1794 = vst.sshfl [vmem:[#allocation15] sm:$0x1 pattern:$0x73625140] %v1638_v32 }
 0x394   :  { %1795 = vst.sshfl [vmem:[#allocation15 + $0x1] sm:$0x1 pattern:$0x73625140] %v1639_v62 }
 0x395   :  { %2298 = shalt.err (!%p2295_p4)
}
 0x396   :  { %s2299_s23 = scalar_lea.hbm %s2675_s13, 32 }
 0x397   :  { %p2300_p5 = scmp.ne.s32.totalorder %s2675_s13, %s2299_s23  ;;  %p2303_p6 = scmp.lt.u32.totalorder %s2299_s23, %s2675_s13 }
 0x399   :  { %p2305_p7 = pnand %p2303_p6, %p2300_p5 }
 0x39b   :  { %2308 = shalt.err (!%p2305_p7)
}
 0x39c   :  { %s2335_s0 = smov 16   ;;  %s2336_s15 = smov 1  }
 0x39d   :  { %1669 = dma.vmem_to_hbm [thread:$0]  %s1664_s7, 32, %s2675_s13, [#allocation5], %s2335_s0, %s2335_s0, %s2336_s15  }
 0x39e   :  { %2317 = dma.done.wait [#allocation5], 32  }
 0x39f   :  { %2318 = vsyncadd [#allocation5], 4294967264 }
 0x3a0   :  { %1673 = vsyncpa [#allocation4], 1 }
 0x3a1   :  { %1674 = vsyncpa [#allocation7], 1 }
 0x3a2   :  { %1675 = vsyncpa [#allocation10], 1 }
 0x3a3   :  { %1676 = vsyncpa [#allocation13], 1 }
 0x3a4   :  { %1677 = vsyncpa [#allocation5], 1 }

</bundles_post_ra>
